<compile_context>
chip_gen: v5e
topology: v5e:2x2
jax: 0.10.0
libtpu: 0.0.40
codegen_flags: <defaults>
</compile_context>

<pallas_src>
import functools

import jax
import jax.numpy as jnp
import numpy as np
from jax.experimental import pallas as pl
from jax.experimental.pallas import tpu as pltpu


def _aeg_kernel(ix_ref, iy1sq_ref, invden_ref, t_ref, d_ref, out_ref):
    """Per-tile body.

    ix_ref, iy1sq_ref, invden_ref, t_ref : (c_out, c_in)  precomputed params
    d_ref                                : (TB, c_in, WH) pixel data
    out_ref                              : (TB, c_out, WH) expectation output
    """
    tb, c_out, wh = out_ref.shape
    c_in = d_ref.shape[1]

    # Tiny parameter tiles: load once per grid step.
    ix_all = ix_ref[...]
    iy1sq_all = iy1sq_ref[...]
    invden_all = invden_ref[...]
    t_all = t_ref[...]

    # One sigmoid over the whole packed (TB, c_in, WH) tile (EUP), sliced
    # per input channel below — shared across c_out.
    sig_all = jax.nn.sigmoid(d_ref[...])

    acc = jnp.zeros((tb, c_out, wh), jnp.float32)

    # Unrolled loop over input channels: each iteration works on a fully
    # packed (TB, c_out, WH) slab (c_out = 8 -> full 8-sublane occupancy).
    # The softmax over c_out is independent per c_in, so the expectation
    # (sum over c_in of coeff * prob) is accumulated online.
    for k in range(c_in):
        d = d_ref[:, k:k + 1, :]                        # (TB, 1, WH)
        sig = sig_all[:, k:k + 1, :]                    # (TB, 1, WH)
        ix = ix_all[:, k:k + 1][None]                   # (1, c_out, 1)
        iy1sq = iy1sq_all[:, k:k + 1][None]             # (1, c_out, 1)
        inv_den = invden_all[:, k:k + 1][None]          # (1, c_out, 1)
        t = t_all[:, k:k + 1][None]                     # (1, c_out, 1)

        # coeff = hyperbolic_inner_product(input_x, input_y, d, 1)
        #       = ((ix - d)^2 + (iy - 1)^2) / (4 * iy)
        coeff = ((ix - d) ** 2 + iy1sq) * inv_den       # (TB, c_out, WH)

        # error = (tests - output) * sigmoid(d)
        err = t * sig                                   # (TB, c_out, WH)
        score = jax.lax.rsqrt(err * err + 1e-7)         # (TB, c_out, WH)

        # softmax over c_out (axis 1) for this c_in slab.
        m = jnp.max(score, axis=1, keepdims=True)       # (TB, 1, WH)
        e = jnp.exp(score - m)                          # (TB, c_out, WH)
        # Exact reciprocal only on the reduced tensor (c_in recips / pixel).
        inv = 1.0 / jnp.sum(e, axis=1, keepdims=True)   # (TB, 1, WH)

        acc = acc + coeff * (e * inv)

    out_ref[...] = acc


@functools.partial(jax.jit, static_argnames=("block_pixels",))
def aeg_conv(data, input_x, input_y, output_x, output_y, linkage_add,
             linkage_mul, *, block_pixels=8192):
    """data: (b, c_in, w, h) float32; params: (c_out, c_in) float32."""
    b, c, w, h = data.shape
    co, ci = input_x.shape
    assert ci == c, "channel_in mismatch"

    f32 = jnp.float32
    ix = input_x.astype(f32)
    iy = input_y.astype(f32)

    # Hoist all parameter-only math (every parameter divide) out of the kernel.
    inv_den = 0.25 / iy                                  # 1 / (4 * input_y)
    iy1sq = (iy - 1.0) ** 2                              # (input_y - 1)^2
    t = ((ix / iy + linkage_add.astype(f32)) * (1.0 + linkage_mul.astype(f32))
         - output_x.astype(f32) / output_y.astype(f32))  # tests - output

    wh = w * h
    # NCHW-native layout: (b, c_in, w*h) is a free reshape; no transposes.
    x = data.reshape(b, c, wh).astype(f32)

    # Batch-tile size: target ~block_pixels pixels (= lanes) per grid step so
    # the per-step overhead stays negligible while the VMEM footprint
    # (in + out, double-buffered) remains well under the scoped limit.
    tb = min(b, max(1, block_pixels // wh))
    b_pad = pl.cdiv(b, tb) * tb
    if b_pad != b:
        x = jnp.pad(x, ((0, b_pad - b), (0, 0), (0, 0)))

    cost = pl.CostEstimate(
        flops=b_pad * wh * ci * (10 * co + 8),
        transcendentals=b_pad * wh * ci * (2 * co + 2),  # rsqrt+exp per (co,ci); sigmoid+recip per ci
        bytes_accessed=(ci + co) * b_pad * wh * 4 + 4 * co * ci * 4,
    )

    param_spec = pl.BlockSpec((co, ci), lambda i: (0, 0))

    out = pl.pallas_call(
        _aeg_kernel,
        out_shape=jax.ShapeDtypeStruct((b_pad, co, wh), f32),
        grid_spec=pltpu.PrefetchScalarGridSpec(
            num_scalar_prefetch=0,
            grid=(b_pad // tb,),
            in_specs=[param_spec] * 4
            + [pl.BlockSpec((tb, c, wh), lambda i: (i, 0, 0))],
            out_specs=pl.BlockSpec((tb, co, wh), lambda i: (i, 0, 0)),
        ),
        compiler_params=pltpu.CompilerParams(
            dimension_semantics=("parallel",)),
        cost_estimate=cost,
    )(ix, iy1sq, inv_den, t, x)

    # (b, c_out, w*h) -> (b, c_out, w, h) is a free reshape.
    return out[:b].reshape(b, co, w, h)


def ref_forward(data, input_x, input_y, output_x, output_y, linkage_add,
                linkage_mul):
    """Pure-JAX mirror of the PyTorch forward (NCHW), for verification."""
    ix, iy, ox, oy, la, lm = (
        p[None, :, :, None, None]
        for p in (input_x, input_y, output_x, output_y, linkage_add,
                  linkage_mul))
    d = data[:, None, :, :, :]                            # (b,1,c,w,h)
    num = (ix - d) ** 2 + (iy - 1.0) ** 2
    den = 4.0 * iy
    coeff = num / den
    inputs = ix / iy
    output = ox / oy
    tests = (inputs + la) * (1.0 + lm)
    error = (tests - output) * jax.nn.sigmoid(d)
    score = 1.0 / jnp.sqrt(error * error + 1e-7)
    prob = jax.nn.softmax(score, axis=1)
    return jnp.sum(coeff * prob, axis=2)                  # (b,c_out,w,h)


if __name__ == "__main__":
    key = jax.random.PRNGKey(0)
    k_data, k_ix, k_iy, k_ox, k_la, k_lm = jax.random.split(key, 6)

    b, c_in, c_out, w, h = 2, 4, 8, 16, 16

    data = jax.random.normal(k_data, (b, c_in, w, h), dtype=jnp.float32)

    # Deterministic parameter init mirroring the PyTorch __init__:
    #   input_x  = 2*rand - 1 ; input_y  = rand + 0.1
    #   output_x = 2*rand - 1 ; output_y = ones + 0.1
    #   linkage_add = rand    ; linkage_mul = rand
    shape = (c_out, c_in)
    input_x = 2.0 * jax.random.uniform(k_ix, shape, dtype=jnp.float32) - 1.0
    input_y = jax.random.uniform(k_iy, shape, dtype=jnp.float32) + 0.1
    output_x = 2.0 * jax.random.uniform(k_ox, shape, dtype=jnp.float32) - 1.0
    output_y = jnp.ones(shape, dtype=jnp.float32) + 0.1
    linkage_add = jax.random.uniform(k_la, shape, dtype=jnp.float32)
    linkage_mul = jax.random.uniform(k_lm, shape, dtype=jnp.float32)

    out = aeg_conv(data, input_x, input_y, output_x, output_y,
                   linkage_add, linkage_mul)
    out = jax.block_until_ready(out)

    ref = ref_forward(data, input_x, input_y, output_x, output_y,
                      linkage_add, linkage_mul)
    ref = jax.block_until_ready(ref)

    assert out.shape == (b, c_out, w, h), out.shape
    # Tolerance matches the previously validated run: rsqrt and the hoisted
    # 0.25/iy are a few ulp away from 1/sqrt and x/(4*iy), which can be
    # amplified through exp(score) for near-degenerate softmax scores.
    np.testing.assert_allclose(np.asarray(out), np.asarray(ref),
                               rtol=5e-4, atol=5e-4)
    print("KERNEL_OK")
</pallas_src>

<mosaic_0001>
module attributes {stable_mosaic.version = 11 : i64} {
  func.func @_aeg_kernel(%arg0: i32, %arg1: memref<8x4xf32, #tpu.memory_space<vmem>>, %arg2: memref<8x4xf32, #tpu.memory_space<vmem>>, %arg3: memref<8x4xf32, #tpu.memory_space<vmem>>, %arg4: memref<8x4xf32, #tpu.memory_space<vmem>>, %arg5: memref<2x4x256xf32, #tpu.memory_space<vmem>>, %arg6: memref<2x8x256xf32, #tpu.memory_space<vmem>>) attributes {dimension_semantics = [#tpu.dimension_semantics<parallel>], iteration_bounds = array<i64: 1>, scalar_prefetch = 0 : i64, scratch_operands = 0 : i64, tpu.core_type = #tpu.core_type<tc>, window_params = [{pipeline_mode = #tpu.pipeline_mode<synchronous>, transform_indices = @transform_0, window_bounds = array<i64: 8, 4>}, {pipeline_mode = #tpu.pipeline_mode<synchronous>, transform_indices = @transform_1, window_bounds = array<i64: 8, 4>}, {pipeline_mode = #tpu.pipeline_mode<synchronous>, transform_indices = @transform_2, window_bounds = array<i64: 8, 4>}, {pipeline_mode = #tpu.pipeline_mode<synchronous>, transform_indices = @transform_3, window_bounds = array<i64: 8, 4>}, {transform_indices = @transform_4, window_bounds = array<i64: 2, 4, 256>}, {transform_indices = @transform_5, window_bounds = array<i64: 2, 8, 256>}]} {
    %c0 = arith.constant 0 : index
    %c0_0 = arith.constant 0 : index
    %0 = vector.load %arg1[%c0, %c0_0] : memref<8x4xf32, #tpu.memory_space<vmem>>, vector<8x4xf32>
    %c0_1 = arith.constant 0 : index
    %c0_2 = arith.constant 0 : index
    %1 = vector.load %arg2[%c0_1, %c0_2] : memref<8x4xf32, #tpu.memory_space<vmem>>, vector<8x4xf32>
    %c0_3 = arith.constant 0 : index
    %c0_4 = arith.constant 0 : index
    %2 = vector.load %arg3[%c0_3, %c0_4] : memref<8x4xf32, #tpu.memory_space<vmem>>, vector<8x4xf32>
    %c0_5 = arith.constant 0 : index
    %c0_6 = arith.constant 0 : index
    %3 = vector.load %arg4[%c0_5, %c0_6] : memref<8x4xf32, #tpu.memory_space<vmem>>, vector<8x4xf32>
    %c0_7 = arith.constant 0 : index
    %c0_8 = arith.constant 0 : index
    %c0_9 = arith.constant 0 : index
    %4 = vector.load %arg5[%c0_7, %c0_8, %c0_9] : memref<2x4x256xf32, #tpu.memory_space<vmem>>, vector<2x4x256xf32>
    %5 = arith.negf %4 : vector<2x4x256xf32>
    %6 = math.exp %5 : vector<2x4x256xf32>
    %cst = arith.constant 1.000000e+00 : f32
    %7 = vector.broadcast %cst : f32 to vector<2x4x256xf32>
    %8 = arith.addf %7, %6 : vector<2x4x256xf32>
    %9 = arith.divf %7, %8 : vector<2x4x256xf32>
    %cst_10 = arith.constant 0.000000e+00 : f32
    %10 = vector.broadcast %cst_10 : f32 to vector<2x8x256xf32>
    %c0_11 = arith.constant 0 : index
    %c0_12 = arith.constant 0 : index
    %c0_13 = arith.constant 0 : index
    %11 = vector.load %arg5[%c0_11, %c0_12, %c0_13] : memref<2x4x256xf32, #tpu.memory_space<vmem>>, vector<2x1x256xf32>
    %12 = vector.extract_strided_slice %9 {offsets = [0, 0, 0], sizes = [2, 1, 256], strides = [1, 1, 1]} : vector<2x4x256xf32> to vector<2x1x256xf32>
    %13 = vector.extract_strided_slice %0 {offsets = [0, 0], sizes = [8, 1], strides = [1, 1]} : vector<8x4xf32> to vector<8x1xf32>
    %14 = vector.shape_cast %13 : vector<8x1xf32> to vector<1x8x1xf32>
    %15 = vector.extract_strided_slice %1 {offsets = [0, 0], sizes = [8, 1], strides = [1, 1]} : vector<8x4xf32> to vector<8x1xf32>
    %16 = vector.shape_cast %15 : vector<8x1xf32> to vector<1x8x1xf32>
    %17 = vector.extract_strided_slice %2 {offsets = [0, 0], sizes = [8, 1], strides = [1, 1]} : vector<8x4xf32> to vector<8x1xf32>
    %18 = vector.shape_cast %17 : vector<8x1xf32> to vector<1x8x1xf32>
    %19 = vector.extract_strided_slice %3 {offsets = [0, 0], sizes = [8, 1], strides = [1, 1]} : vector<8x4xf32> to vector<8x1xf32>
    %20 = vector.shape_cast %19 : vector<8x1xf32> to vector<1x8x1xf32>
    %21 = vector.broadcast %14 : vector<1x8x1xf32> to vector<2x8x256xf32>
    %22 = vector.broadcast %11 : vector<2x1x256xf32> to vector<2x8x256xf32>
    %23 = arith.subf %21, %22 : vector<2x8x256xf32>
    %24 = arith.mulf %23, %23 : vector<2x8x256xf32>
    %25 = vector.broadcast %16 : vector<1x8x1xf32> to vector<2x8x256xf32>
    %26 = arith.addf %24, %25 : vector<2x8x256xf32>
    %27 = vector.broadcast %18 : vector<1x8x1xf32> to vector<2x8x256xf32>
    %28 = arith.mulf %26, %27 : vector<2x8x256xf32>
    %29 = vector.broadcast %20 : vector<1x8x1xf32> to vector<2x8x256xf32>
    %30 = vector.broadcast %12 : vector<2x1x256xf32> to vector<2x8x256xf32>
    %31 = arith.mulf %29, %30 : vector<2x8x256xf32>
    %32 = arith.mulf %31, %31 : vector<2x8x256xf32>
    %cst_14 = arith.constant 1.000000e-07 : f32
    %33 = vector.broadcast %cst_14 : f32 to vector<2x8x256xf32>
    %34 = arith.addf %32, %33 : vector<2x8x256xf32>
    %35 = math.rsqrt %34 : vector<2x8x256xf32>
    %cst_15 = arith.constant dense<0xFF800000> : vector<2x256xf32>
    %36 = vector.multi_reduction <maximumf>, %35, %cst_15 [1] : vector<2x8x256xf32> to vector<2x256xf32>
    %37 = vector.shape_cast %36 : vector<2x256xf32> to vector<2x1x256xf32>
    %38 = vector.broadcast %37 : vector<2x1x256xf32> to vector<2x8x256xf32>
    %39 = arith.subf %35, %38 : vector<2x8x256xf32>
    %40 = math.exp %39 : vector<2x8x256xf32>
    %cst_16 = arith.constant dense<0.000000e+00> : vector<2x256xf32>
    %41 = vector.multi_reduction <add>, %40, %cst_16 [1] : vector<2x8x256xf32> to vector<2x256xf32>
    %42 = vector.shape_cast %41 : vector<2x256xf32> to vector<2x1x256xf32>
    %cst_17 = arith.constant 1.000000e+00 : f32
    %43 = vector.broadcast %cst_17 : f32 to vector<2x1x256xf32>
    %44 = arith.divf %43, %42 : vector<2x1x256xf32>
    %45 = vector.broadcast %44 : vector<2x1x256xf32> to vector<2x8x256xf32>
    %46 = arith.mulf %40, %45 : vector<2x8x256xf32>
    %47 = arith.mulf %28, %46 : vector<2x8x256xf32>
    %48 = arith.addf %10, %47 : vector<2x8x256xf32>
    %c0_18 = arith.constant 0 : index
    %c1 = arith.constant 1 : index
    %c0_19 = arith.constant 0 : index
    %49 = vector.load %arg5[%c0_18, %c1, %c0_19] : memref<2x4x256xf32, #tpu.memory_space<vmem>>, vector<2x1x256xf32>
    %50 = vector.extract_strided_slice %9 {offsets = [0, 1, 0], sizes = [2, 1, 256], strides = [1, 1, 1]} : vector<2x4x256xf32> to vector<2x1x256xf32>
    %51 = vector.extract_strided_slice %0 {offsets = [0, 1], sizes = [8, 1], strides = [1, 1]} : vector<8x4xf32> to vector<8x1xf32>
    %52 = vector.shape_cast %51 : vector<8x1xf32> to vector<1x8x1xf32>
    %53 = vector.extract_strided_slice %1 {offsets = [0, 1], sizes = [8, 1], strides = [1, 1]} : vector<8x4xf32> to vector<8x1xf32>
    %54 = vector.shape_cast %53 : vector<8x1xf32> to vector<1x8x1xf32>
    %55 = vector.extract_strided_slice %2 {offsets = [0, 1], sizes = [8, 1], strides = [1, 1]} : vector<8x4xf32> to vector<8x1xf32>
    %56 = vector.shape_cast %55 : vector<8x1xf32> to vector<1x8x1xf32>
    %57 = vector.extract_strided_slice %3 {offsets = [0, 1], sizes = [8, 1], strides = [1, 1]} : vector<8x4xf32> to vector<8x1xf32>
    %58 = vector.shape_cast %57 : vector<8x1xf32> to vector<1x8x1xf32>
    %59 = vector.broadcast %52 : vector<1x8x1xf32> to vector<2x8x256xf32>
    %60 = vector.broadcast %49 : vector<2x1x256xf32> to vector<2x8x256xf32>
    %61 = arith.subf %59, %60 : vector<2x8x256xf32>
    %62 = arith.mulf %61, %61 : vector<2x8x256xf32>
    %63 = vector.broadcast %54 : vector<1x8x1xf32> to vector<2x8x256xf32>
    %64 = arith.addf %62, %63 : vector<2x8x256xf32>
    %65 = vector.broadcast %56 : vector<1x8x1xf32> to vector<2x8x256xf32>
    %66 = arith.mulf %64, %65 : vector<2x8x256xf32>
    %67 = vector.broadcast %58 : vector<1x8x1xf32> to vector<2x8x256xf32>
    %68 = vector.broadcast %50 : vector<2x1x256xf32> to vector<2x8x256xf32>
    %69 = arith.mulf %67, %68 : vector<2x8x256xf32>
    %70 = arith.mulf %69, %69 : vector<2x8x256xf32>
    %cst_20 = arith.constant 1.000000e-07 : f32
    %71 = vector.broadcast %cst_20 : f32 to vector<2x8x256xf32>
    %72 = arith.addf %70, %71 : vector<2x8x256xf32>
    %73 = math.rsqrt %72 : vector<2x8x256xf32>
    %cst_21 = arith.constant dense<0xFF800000> : vector<2x256xf32>
    %74 = vector.multi_reduction <maximumf>, %73, %cst_21 [1] : vector<2x8x256xf32> to vector<2x256xf32>
    %75 = vector.shape_cast %74 : vector<2x256xf32> to vector<2x1x256xf32>
    %76 = vector.broadcast %75 : vector<2x1x256xf32> to vector<2x8x256xf32>
    %77 = arith.subf %73, %76 : vector<2x8x256xf32>
    %78 = math.exp %77 : vector<2x8x256xf32>
    %cst_22 = arith.constant dense<0.000000e+00> : vector<2x256xf32>
    %79 = vector.multi_reduction <add>, %78, %cst_22 [1] : vector<2x8x256xf32> to vector<2x256xf32>
    %80 = vector.shape_cast %79 : vector<2x256xf32> to vector<2x1x256xf32>
    %cst_23 = arith.constant 1.000000e+00 : f32
    %81 = vector.broadcast %cst_23 : f32 to vector<2x1x256xf32>
    %82 = arith.divf %81, %80 : vector<2x1x256xf32>
    %83 = vector.broadcast %82 : vector<2x1x256xf32> to vector<2x8x256xf32>
    %84 = arith.mulf %78, %83 : vector<2x8x256xf32>
    %85 = arith.mulf %66, %84 : vector<2x8x256xf32>
    %86 = arith.addf %48, %85 : vector<2x8x256xf32>
    %c0_24 = arith.constant 0 : index
    %c2 = arith.constant 2 : index
    %c0_25 = arith.constant 0 : index
    %87 = vector.load %arg5[%c0_24, %c2, %c0_25] : memref<2x4x256xf32, #tpu.memory_space<vmem>>, vector<2x1x256xf32>
    %88 = vector.extract_strided_slice %9 {offsets = [0, 2, 0], sizes = [2, 1, 256], strides = [1, 1, 1]} : vector<2x4x256xf32> to vector<2x1x256xf32>
    %89 = vector.extract_strided_slice %0 {offsets = [0, 2], sizes = [8, 1], strides = [1, 1]} : vector<8x4xf32> to vector<8x1xf32>
    %90 = vector.shape_cast %89 : vector<8x1xf32> to vector<1x8x1xf32>
    %91 = vector.extract_strided_slice %1 {offsets = [0, 2], sizes = [8, 1], strides = [1, 1]} : vector<8x4xf32> to vector<8x1xf32>
    %92 = vector.shape_cast %91 : vector<8x1xf32> to vector<1x8x1xf32>
    %93 = vector.extract_strided_slice %2 {offsets = [0, 2], sizes = [8, 1], strides = [1, 1]} : vector<8x4xf32> to vector<8x1xf32>
    %94 = vector.shape_cast %93 : vector<8x1xf32> to vector<1x8x1xf32>
    %95 = vector.extract_strided_slice %3 {offsets = [0, 2], sizes = [8, 1], strides = [1, 1]} : vector<8x4xf32> to vector<8x1xf32>
    %96 = vector.shape_cast %95 : vector<8x1xf32> to vector<1x8x1xf32>
    %97 = vector.broadcast %90 : vector<1x8x1xf32> to vector<2x8x256xf32>
    %98 = vector.broadcast %87 : vector<2x1x256xf32> to vector<2x8x256xf32>
    %99 = arith.subf %97, %98 : vector<2x8x256xf32>
    %100 = arith.mulf %99, %99 : vector<2x8x256xf32>
    %101 = vector.broadcast %92 : vector<1x8x1xf32> to vector<2x8x256xf32>
    %102 = arith.addf %100, %101 : vector<2x8x256xf32>
    %103 = vector.broadcast %94 : vector<1x8x1xf32> to vector<2x8x256xf32>
    %104 = arith.mulf %102, %103 : vector<2x8x256xf32>
    %105 = vector.broadcast %96 : vector<1x8x1xf32> to vector<2x8x256xf32>
    %106 = vector.broadcast %88 : vector<2x1x256xf32> to vector<2x8x256xf32>
    %107 = arith.mulf %105, %106 : vector<2x8x256xf32>
    %108 = arith.mulf %107, %107 : vector<2x8x256xf32>
    %cst_26 = arith.constant 1.000000e-07 : f32
    %109 = vector.broadcast %cst_26 : f32 to vector<2x8x256xf32>
    %110 = arith.addf %108, %109 : vector<2x8x256xf32>
    %111 = math.rsqrt %110 : vector<2x8x256xf32>
    %cst_27 = arith.constant dense<0xFF800000> : vector<2x256xf32>
    %112 = vector.multi_reduction <maximumf>, %111, %cst_27 [1] : vector<2x8x256xf32> to vector<2x256xf32>
    %113 = vector.shape_cast %112 : vector<2x256xf32> to vector<2x1x256xf32>
    %114 = vector.broadcast %113 : vector<2x1x256xf32> to vector<2x8x256xf32>
    %115 = arith.subf %111, %114 : vector<2x8x256xf32>
    %116 = math.exp %115 : vector<2x8x256xf32>
    %cst_28 = arith.constant dense<0.000000e+00> : vector<2x256xf32>
    %117 = vector.multi_reduction <add>, %116, %cst_28 [1] : vector<2x8x256xf32> to vector<2x256xf32>
    %118 = vector.shape_cast %117 : vector<2x256xf32> to vector<2x1x256xf32>
    %cst_29 = arith.constant 1.000000e+00 : f32
    %119 = vector.broadcast %cst_29 : f32 to vector<2x1x256xf32>
    %120 = arith.divf %119, %118 : vector<2x1x256xf32>
    %121 = vector.broadcast %120 : vector<2x1x256xf32> to vector<2x8x256xf32>
    %122 = arith.mulf %116, %121 : vector<2x8x256xf32>
    %123 = arith.mulf %104, %122 : vector<2x8x256xf32>
    %124 = arith.addf %86, %123 : vector<2x8x256xf32>
    %c0_30 = arith.constant 0 : index
    %c3 = arith.constant 3 : index
    %c0_31 = arith.constant 0 : index
    %125 = vector.load %arg5[%c0_30, %c3, %c0_31] : memref<2x4x256xf32, #tpu.memory_space<vmem>>, vector<2x1x256xf32>
    %126 = vector.extract_strided_slice %9 {offsets = [0, 3, 0], sizes = [2, 1, 256], strides = [1, 1, 1]} : vector<2x4x256xf32> to vector<2x1x256xf32>
    %127 = vector.extract_strided_slice %0 {offsets = [0, 3], sizes = [8, 1], strides = [1, 1]} : vector<8x4xf32> to vector<8x1xf32>
    %128 = vector.shape_cast %127 : vector<8x1xf32> to vector<1x8x1xf32>
    %129 = vector.extract_strided_slice %1 {offsets = [0, 3], sizes = [8, 1], strides = [1, 1]} : vector<8x4xf32> to vector<8x1xf32>
    %130 = vector.shape_cast %129 : vector<8x1xf32> to vector<1x8x1xf32>
    %131 = vector.extract_strided_slice %2 {offsets = [0, 3], sizes = [8, 1], strides = [1, 1]} : vector<8x4xf32> to vector<8x1xf32>
    %132 = vector.shape_cast %131 : vector<8x1xf32> to vector<1x8x1xf32>
    %133 = vector.extract_strided_slice %3 {offsets = [0, 3], sizes = [8, 1], strides = [1, 1]} : vector<8x4xf32> to vector<8x1xf32>
    %134 = vector.shape_cast %133 : vector<8x1xf32> to vector<1x8x1xf32>
    %135 = vector.broadcast %128 : vector<1x8x1xf32> to vector<2x8x256xf32>
    %136 = vector.broadcast %125 : vector<2x1x256xf32> to vector<2x8x256xf32>
    %137 = arith.subf %135, %136 : vector<2x8x256xf32>
    %138 = arith.mulf %137, %137 : vector<2x8x256xf32>
    %139 = vector.broadcast %130 : vector<1x8x1xf32> to vector<2x8x256xf32>
    %140 = arith.addf %138, %139 : vector<2x8x256xf32>
    %141 = vector.broadcast %132 : vector<1x8x1xf32> to vector<2x8x256xf32>
    %142 = arith.mulf %140, %141 : vector<2x8x256xf32>
    %143 = vector.broadcast %134 : vector<1x8x1xf32> to vector<2x8x256xf32>
    %144 = vector.broadcast %126 : vector<2x1x256xf32> to vector<2x8x256xf32>
    %145 = arith.mulf %143, %144 : vector<2x8x256xf32>
    %146 = arith.mulf %145, %145 : vector<2x8x256xf32>
    %cst_32 = arith.constant 1.000000e-07 : f32
    %147 = vector.broadcast %cst_32 : f32 to vector<2x8x256xf32>
    %148 = arith.addf %146, %147 : vector<2x8x256xf32>
    %149 = math.rsqrt %148 : vector<2x8x256xf32>
    %cst_33 = arith.constant dense<0xFF800000> : vector<2x256xf32>
    %150 = vector.multi_reduction <maximumf>, %149, %cst_33 [1] : vector<2x8x256xf32> to vector<2x256xf32>
    %151 = vector.shape_cast %150 : vector<2x256xf32> to vector<2x1x256xf32>
    %152 = vector.broadcast %151 : vector<2x1x256xf32> to vector<2x8x256xf32>
    %153 = arith.subf %149, %152 : vector<2x8x256xf32>
    %154 = math.exp %153 : vector<2x8x256xf32>
    %cst_34 = arith.constant dense<0.000000e+00> : vector<2x256xf32>
    %155 = vector.multi_reduction <add>, %154, %cst_34 [1] : vector<2x8x256xf32> to vector<2x256xf32>
    %156 = vector.shape_cast %155 : vector<2x256xf32> to vector<2x1x256xf32>
    %cst_35 = arith.constant 1.000000e+00 : f32
    %157 = vector.broadcast %cst_35 : f32 to vector<2x1x256xf32>
    %158 = arith.divf %157, %156 : vector<2x1x256xf32>
    %159 = vector.broadcast %158 : vector<2x1x256xf32> to vector<2x8x256xf32>
    %160 = arith.mulf %154, %159 : vector<2x8x256xf32>
    %161 = arith.mulf %142, %160 : vector<2x8x256xf32>
    %162 = arith.addf %124, %161 : vector<2x8x256xf32>
    %c0_36 = arith.constant 0 : index
    %c0_37 = arith.constant 0 : index
    %c0_38 = arith.constant 0 : index
    %163 = vector.load %arg6[%c0_36, %c0_37, %c0_38] : memref<2x8x256xf32, #tpu.memory_space<vmem>>, vector<2x8x256xf32>
    tpu.vector_store %arg6[%c0_36, %c0_37, %c0_38], %162 {strides = array<i32>} : memref<2x8x256xf32, #tpu.memory_space<vmem>>, vector<2x8x256xf32>,
    return
  }
  func.func @transform_0(%arg0: i32) -> (i32, i32) {
    %c0_i32 = arith.constant 0 : i32
    %c0_i32_0 = arith.constant 0 : i32
    %c0_i32_1 = arith.constant 0 : i32
    return %c0_i32, %c0_i32_0 : i32, i32
  }
  func.func @transform_1(%arg0: i32) -> (i32, i32) {
    %c0_i32 = arith.constant 0 : i32
    %c0_i32_0 = arith.constant 0 : i32
    %c0_i32_1 = arith.constant 0 : i32
    return %c0_i32, %c0_i32_0 : i32, i32
  }
  func.func @transform_2(%arg0: i32) -> (i32, i32) {
    %c0_i32 = arith.constant 0 : i32
    %c0_i32_0 = arith.constant 0 : i32
    %c0_i32_1 = arith.constant 0 : i32
    return %c0_i32, %c0_i32_0 : i32, i32
  }
  func.func @transform_3(%arg0: i32) -> (i32, i32) {
    %c0_i32 = arith.constant 0 : i32
    %c0_i32_0 = arith.constant 0 : i32
    %c0_i32_1 = arith.constant 0 : i32
    return %c0_i32, %c0_i32_0 : i32, i32
  }
  func.func @transform_4(%arg0: i32) -> (i32, i32, i32) {
    %c0_i32 = arith.constant 0 : i32
    %c0_i32_0 = arith.constant 0 : i32
    %c0_i32_1 = arith.constant 0 : i32
    return %arg0, %c0_i32, %c0_i32_0 : i32, i32, i32
  }
  func.func @transform_5(%arg0: i32) -> (i32, i32, i32) {
    %c0_i32 = arith.constant 0 : i32
    %c0_i32_0 = arith.constant 0 : i32
    %c0_i32_1 = arith.constant 0 : i32
    return %arg0, %c0_i32, %c0_i32_0 : i32, i32, i32
  }
}

</mosaic_0001>

<bundles_post_ra>
// kernel: aeg_conv.1
= control target key start
LH: loop header
LB: loop body
LE: loop exit
PB: predicated region body
PF: predicated region fallthrough
CT: control target
= control target key end

     0   :  { %v1176_v0 = vmov 2   ;;  %v1177_v1 = vmov 0   ;;  %v1178_v4 = vmov 3   ;;  %v1179_v5 = vmov 1   ;;  %s2103_s3 = inlined_call_operand.vmem [shape: f32[8,4], index: 3, kind: input, shape index: {}]   ;;  %s2104_s0 = inlined_call_operand.vmem [shape: f32[8,4], index: 0, kind: input, shape index: {}]   ;;  %s2105_s1 = inlined_call_operand.vmem [shape: f32[8,4], index: 1, kind: input, shape index: {}]   ;;  %s2106_s2 = inlined_call_operand.vmem [shape: f32[8,4], index: 2, kind: input, shape index: {}]   ;;  %s2107_s4 = inlined_call_operand.vmem [shape: f32[2,4,256], index: 4, kind: input, shape index: {}]   ;;  %s2108_s5 = inlined_call_operand.vmem [shape: f32[2,8,256], index: 5, kind: output, shape index: {}]  }
   0x1   :  { %1060 = vset.pattern.permute.xlu1 %v1176_v0  ;;  %1058 = vset.pattern.permute.xlu0 %v1177_v1  ;;  %v23_v2 = vld [vmem:[%s2103_s3] sm:$0xff]  ;;  %v25_v9 = vld [vmem:[%s2107_s4 + $0x8] sm:$0xff] }
   0x2   :  { %v20_v3 = vld [vmem:[%s2104_s0] sm:$0xff]  ;;  %596 = vperm.xlu1 %1060, %v23_v2   ;;  %110 = vperm.xlu0 %1058, %v23_v2   ;;  %v1046_v11 = vmul.f32 -1.442695, %v25_v9 }
   0x3   :  { %1062 = vset.pattern.permute.xlu2 %v1177_v1  ;;  %v21_v6 = vld [vmem:[%s2105_s1] sm:$0xff] }
   0x4   :  { %69 = vperm.xlu2 %1062, %v20_v3   ;;  %v22_v7 = vld [vmem:[%s2106_s2] sm:$0xff] }
   0x5   :  { %v24_v8 = vld [vmem:[%s2107_s4] sm:$0xff] }
   0x6   :  { %v1045_v10 = vmul.f32 -1.442695, %v24_v8 }
   0x8   :  { %1072 = vpow2.f32 %v1045_v10 }
   0x9   :  { %1074 = vpow2.f32 %v1046_v11 }
   0xa   :  { %1061 = vset.pattern.permute.xlu1 %v1178_v4  ;;  %1059 = vset.pattern.permute.xlu0 %v1179_v5 }
   0xb   :  { %838 = vperm.xlu1 %1061, %v23_v2   ;;  %354 = vperm.xlu0 %1059, %v23_v2  }
   0xc   :  { %92 = vperm.xlu2 %1062, %v21_v6  }
   0xe   :  { %v1073_v12 = vpop.eup %1072 }
   0xf   :  { %v1075_v13 = vpop.eup %1074  ;;  %v32_v14 = vadd.f32 1.0, %v1073_v12 }
  0x10   :  { %v33_v15 = vadd.f32 1.0, %v1075_v13 }
  0x11   :  { %1076 = vrcp.f32 %v32_v14  ;;  %vm39_vm0 = vweird.f32 %v32_v14  ;;  %v45_v24 = vand.u32 2147483648, %v32_v14  ;;  %v43_v27 = vand.u32 2147483647, %v32_v14 }
  0x12   :  { %1078 = vrcp.f32 %v33_v15  ;;  %vm54_vm2 = vweird.f32 %v33_v15  ;;  %v60_v25 = vand.u32 2147483648, %v33_v15  ;;  %v58_v29 = vand.u32 2147483647, %v33_v15 }
  0x13   :  { %1063 = vset.pattern.permute.xlu1 %v1177_v1  ;;  %1065 = vset.pattern.permute.xlu0 %v1176_v0  ;;  %v46_v30 = vor.u32 1.1754944e-38, %v45_v24  ;;  %vm44_vm6 = vcmp.eq.f32.partialorder %v43_v27, 8.507059e+37 }
  0x14   :  { %101 = vperm.xlu1 %1063, %v22_v7   ;;  %558 = vperm.xlu0 %1065, %v20_v3   ;;  %v61_v31 = vor.u32 1.1754944e-38, %v60_v25  ;;  %vm59_vm7 = vcmp.eq.f32.partialorder %v58_v29, 8.507059e+37 }
  0x15   :  { %1064 = vset.pattern.permute.xlu2 %v1179_v5 }
  0x16   :  { %316 = vperm.xlu2 %1064, %v20_v3  }
  0x17   :  { %v1077_v16 = vpop.eup %1076 }
  0x18   :  { %v1079_v17 = vpop.eup %1078  ;;  %v35_v18 = vmul.f32 %v1077_v16, %v32_v14  ;;  %vm40_vm1 = vweird.f32 %v1077_v16 }
  0x19   :  { %v50_v19 = vmul.f32 %v1079_v17, %v33_v15  ;;  %vm55_vm3 = vweird.f32 %v1079_v17  ;;  %vm41_vm4 = vmor %vm39_vm0, %vm40_vm1 }
  0x1a   :  { %v36_v20 = vsub.f32 1.0, %v35_v18  ;;  %vm56_vm5 = vmor %vm54_vm2, %vm55_vm3 }
  0x1b   :  { %v51_v21 = vsub.f32 1.0, %v50_v19 }
  0x1c   :  { %1066 = vset.pattern.permute.xlu1 %v1179_v5  ;;  %588 = vperm.xlu0 %1065, %v22_v7   ;;  %v37_v22 = vmul.f32 %v1077_v16, %v36_v20 }
  0x1d   :  { %338 = vperm.xlu1 %1066, %v21_v6   ;;  %v52_v23 = vmul.f32 %v1079_v17, %v51_v21 }
  0x1e   :  { %1067 = vset.pattern.permute.xlu2 %v1178_v4  ;;  %v38_v26 = vadd.f32 %v1077_v16, %v37_v22 }
  0x1f   :  { %800 = vperm.xlu2 %1067, %v20_v3   ;;  %v53_v28 = vadd.f32 %v1079_v17, %v52_v23 }
  0x20   :  { %v42_v32 = vsel %vm41_vm4, %v1077_v16, %v38_v26 }
  0x21   :  { %v57_v33 = vsel %vm56_vm5, %v1079_v17, %v53_v28  ;;  %v1228_v34 = vsel %vm44_vm6, %v46_v30, %v42_v32 }
  0x22   :  { %v1230_v35 = vsel %vm59_vm7, %v61_v31, %v57_v33  ;;  %v599_v36 = vperm.slane %v1228_v34, 2  ;;  %v600_v37 = vperm.slane %v1228_v34, 6  ;;  %v115_v40 = vperm.slane %v1228_v34, 0 }
  0x23   :  { %v601_v38 = vperm.slane %v1230_v35, 2  ;;  %v602_v39 = vperm.slane %v1230_v35, 6  ;;  %v116_v41 = vperm.slane %v1228_v34, 4  ;;  %v117_v42 = vperm.slane %v1230_v35, 0 }
  0x24   :  { %1071 = vset.pattern.permute.xlu0 %v1178_v4  ;;  %v118_v43 = vperm.slane %v1230_v35, 4  ;;  %v607_v44 = vperm.slane %v599_v36, 2  ;;  %v608_v45 = vperm.slane %v600_v37, 2  ;;  %v123_v48 = vperm.slane %v115_v40, 0 }
  0x25   :  { %346 = vperm.xlu1 %1066, %v22_v7   ;;  %v609_v46 = vperm.slane %v601_v38, 2  ;;  %v610_v47 = vperm.slane %v602_v39, 2  ;;  %v124_v49 = vperm.slane %v116_v41, 0  ;;  %v125_v50 = vperm.slane %v117_v42, 0 }
  0x26   :  { %v126_v51 = vperm.slane %v118_v43, 0  ;;  %v841_v54 = vperm.slane %v1228_v34, 3  ;;  %v842_v17 = vperm.slane %v1228_v34, 7  ;;  %v843_v20 = vperm.slane %v1230_v35, 3 }
  0x27   :  { %1068 = vset.pattern.permute.xlu2 %v1176_v0  ;;  %v844_v23 = vperm.slane %v1230_v35, 7 }
  0x28   :  { %580 = vperm.xlu2 %1068, %v21_v6   ;;  %v849_v12 = vperm.slane %v841_v54, 3  ;;  %v1272_v24 = vperm.slane %v842_v17, 3 }
  0x2d   :  { %1069 = vset.pattern.permute.xlu1 %v1178_v4 }
  0x2e   :  { %822 = vperm.xlu1 %1069, %v21_v6  }
  0x30   :  { %1070 = vset.pattern.permute.xlu2 %v1178_v4 }
  0x31   :  { %830 = vperm.xlu2 %1070, %v22_v7  }
  0x74   :  { %v597_v52 = vpop.permute.xlu1 %596  ;;  %v111_v53 = vpop.permute.xlu0 %110 }
  0x75   :  { %v611_v55 = vmul.f32 %v607_v44, %v597_v52  ;;  %v612_v56 = vmul.f32 %v608_v45, %v597_v52  ;;  %v613_v57 = vmul.f32 %v609_v46, %v597_v52  ;;  %v614_v58 = vmul.f32 %v610_v47, %v597_v52 }
  0x76   :  { %v127_v59 = vmul.f32 %v123_v48, %v111_v53  ;;  %v128_v60 = vmul.f32 %v124_v49, %v111_v53  ;;  %v129_v61 = vmul.f32 %v125_v50, %v111_v53  ;;  %v130_v62 = vmul.f32 %v126_v51, %v111_v53 }
  0x77   :  { %v615_v63 = vmul.f32 %v611_v55, %v611_v55  ;;  %v616_v0 = vmul.f32 %v612_v56, %v612_v56  ;;  %v617_v1 = vmul.f32 %v613_v57, %v613_v57  ;;  %v618_v2 = vmul.f32 %v614_v58, %v614_v58 }
  0x78   :  { %v131_v3 = vmul.f32 %v127_v59, %v127_v59  ;;  %v132_v4 = vmul.f32 %v128_v60, %v128_v60  ;;  %v133_v8 = vmul.f32 %v129_v61, %v129_v61  ;;  %v134_v10 = vmul.f32 %v130_v62, %v130_v62 }
  0x79   :  { %v1241_v5 = vadd.f32 1e-07, %v615_v63  ;;  %v1243_v6 = vadd.f32 1e-07, %v616_v0  ;;  %v1245_v7 = vadd.f32 1e-07, %v617_v1 }
  0x7a   :  { %v1247_v9 = vadd.f32 1e-07, %v618_v2  ;;  %v1250_v11 = vadd.f32 1e-07, %v131_v3  ;;  %v1253_v13 = vadd.f32 1e-07, %v132_v4 }
  0x7b   :  { %1080 = vrsqrt.f32 %v1241_v5  ;;  %v1256_v14 = vadd.f32 1e-07, %v133_v8  ;;  %v1261_v16 = vadd.f32 1e-07, %v134_v10  ;;  %vm629_vm8 = vweird.f32 %v1241_v5 }
  0x7c   :  { %1082 = vrsqrt.f32 %v1243_v6  ;;  %vm639_vm9 = vweird.f32 %v1243_v6  ;;  %vm649_vm12 = vweird.f32 %v1245_v7  ;;  %vm659_vm14 = vweird.f32 %v1247_v9 }
  0x7d   :  { %1084 = vrsqrt.f32 %v1245_v7  ;;  %v1258_v15 = vpop.permute.xlu1 %838  ;;  %vm145_vm0 = vweird.f32 %v1250_v11  ;;  %vm155_vm2 = vweird.f32 %v1253_v13  ;;  %vm165_vm4 = vweird.f32 %v1256_v14 }
  0x7e   :  { %1086 = vrsqrt.f32 %v1247_v9  ;;  %v853_v18 = vmul.f32 %v849_v12, %v1258_v15 }
  0x7f   :  { %1088 = vrsqrt.f32 %v1250_v11 }
  0x80   :  { %1090 = vrsqrt.f32 %v1253_v13  ;;  %v1277_v27 = vmul.f32 %v853_v18, %v853_v18 }
  0x81   :  { %v1081_v19 = vpop.eup %1080  ;;  %1092 = vrsqrt.f32 %v1256_v14 }
  0x82   :  { %v1083_v21 = vpop.eup %1082  ;;  %v624_v22 = vmul.f32 %v1081_v19, %v1241_v5  ;;  %1094 = vrsqrt.f32 %v1261_v16  ;;  %vm630_vm10 = vweird.f32 %v1081_v19 }
  0x83   :  { %v1085_v25 = vpop.eup %1084  ;;  %v634_v26 = vmul.f32 %v1083_v21, %v1243_v6  ;;  %vm640_vm11 = vweird.f32 %v1083_v21  ;;  %vm631_vm6 = vmor %vm629_vm8, %vm630_vm10 }
  0x84   :  { %v1087_v28 = vpop.eup %1086  ;;  %v625_v29 = vmul.f32 %v1081_v19, %v624_v22  ;;  %v644_v30 = vmul.f32 %v1085_v25, %v1245_v7  ;;  %vm650_vm13 = vweird.f32 %v1085_v25  ;;  %vm641_vm7 = vmor %vm639_vm9, %vm640_vm11 }
  0x85   :  { %v1089_v31 = vpop.eup %1088  ;;  %v635_v32 = vmul.f32 %v1083_v21, %v634_v26  ;;  %v654_v33 = vmul.f32 %v1087_v28, %v1247_v9  ;;  %vm660_vm15 = vweird.f32 %v1087_v28  ;;  %vm651_vm8 = vmor %vm649_vm12, %vm650_vm13 }
  0x86   :  { %v1091_v36 = vpop.eup %1090  ;;  %v626_v37 = vmul.f32 0.5, %v625_v29  ;;  %v645_v38 = vmul.f32 %v1085_v25, %v644_v30  ;;  %v140_v39 = vmul.f32 %v1089_v31, %v1250_v11  ;;  %vm146_vm1 = vweird.f32 %v1089_v31  ;;  %vm661_vm10 = vmor %vm659_vm14, %vm660_vm15 }
  0x87   :  { %v1093_v40 = vpop.eup %1092  ;;  %v636_v41 = vmul.f32 0.5, %v635_v32  ;;  %v655_v42 = vmul.f32 %v1087_v28, %v654_v33  ;;  %v150_v43 = vmul.f32 %v1091_v36, %v1253_v13  ;;  %vm156_vm3 = vweird.f32 %v1091_v36  ;;  %vm147_vm9 = vmor %vm145_vm0, %vm146_vm1 }
  0x88   :  { %v1287_v44 = vpop.eup %1094  ;;  %v627_v45 = vsub.f32 1.5, %v626_v37  ;;  %v646_v46 = vmul.f32 0.5, %v645_v38  ;;  %v141_v47 = vmul.f32 %v1089_v31, %v140_v39  ;;  %v160_v48 = vmul.f32 %v1093_v40, %v1256_v14  ;;  %vm157_vm11 = vmor %vm155_vm2, %vm156_vm3 }
  0x89   :  { %v637_v49 = vsub.f32 1.5, %v636_v41  ;;  %v656_v50 = vmul.f32 0.5, %v655_v42  ;;  %v151_v51 = vmul.f32 %v1091_v36, %v150_v43  ;;  %vm166_vm5 = vweird.f32 %v1093_v40 }
  0x8a   :  { %v628_v52 = vmul.f32 %v1081_v19, %v627_v45  ;;  %v647_v53 = vsub.f32 1.5, %v646_v46  ;;  %v142_v54 = vmul.f32 0.5, %v141_v47  ;;  %v161_v55 = vmul.f32 %v1093_v40, %v160_v48  ;;  %vm167_vm12 = vmor %vm165_vm4, %vm166_vm5 }
  0x8b   :  { %v638_v56 = vmul.f32 %v1083_v21, %v637_v49  ;;  %v657_v57 = vsub.f32 1.5, %v656_v50  ;;  %v152_v58 = vmul.f32 0.5, %v151_v51  ;;  %v170_v59 = vmul.f32 %v1287_v44, %v1261_v16 }
  0x8c   :  { %v1296_v60 = vsel %vm631_vm6, %v1081_v19, %v628_v52  ;;  %v648_v61 = vmul.f32 %v1085_v25, %v647_v53  ;;  %v143_v62 = vsub.f32 1.5, %v142_v54  ;;  %v162_v63 = vmul.f32 0.5, %v161_v55 }
  0x8d   :  { %v1301_v0 = vsel %vm641_vm7, %v1083_v21, %v638_v56  ;;  %v658_v1 = vmul.f32 %v1087_v28, %v657_v57  ;;  %v663_v2 = vrot.slane %v1296_v60, 4  ;;  %v153_v3 = vsub.f32 1.5, %v152_v58 }
  0x8e   :  { %v1307_v4 = vsel %vm651_vm8, %v1085_v25, %v648_v61  ;;  %v669_v5 = vrot.slane %v1301_v0, 4  ;;  %v144_v6 = vmul.f32 %v1089_v31, %v143_v62  ;;  %v163_v8 = vsub.f32 1.5, %v162_v63 }
  0x8f   :  { %v1313_v10 = vsel %vm661_vm10, %v1087_v28, %v658_v1  ;;  %v664_v12 = vmax.f32 %v1296_v60, %v663_v2  ;;  %v675_v7 = vrot.slane %v1307_v4, 4  ;;  %v154_v17 = vmul.f32 %v1091_v36, %v153_v3 }
  0x90   :  { %v670_v18 = vmax.f32 %v1301_v0, %v669_v5  ;;  %v681_v9 = vrot.slane %v1313_v10, 4  ;;  %v1322_v19 = vsel %vm147_vm9, %v1089_v31, %v144_v6  ;;  %v164_v21 = vmul.f32 %v1093_v40, %v163_v8 }
  0x91   :  { %v665_v22 = vrot.slane %v664_v12, 2  ;;  %v676_v25 = vmax.f32 %v1307_v4, %v675_v7  ;;  %v1328_v26 = vsel %vm157_vm11, %v1091_v36, %v154_v17  ;;  %v171_v11 = vmul.f32 %v1287_v44, %v170_v59 }
  0x92   :  { %v671_v28 = vrot.slane %v670_v18, 2  ;;  %v682_v29 = vmax.f32 %v1313_v10, %v681_v9  ;;  %v1335_v30 = vsel %vm167_vm12, %v1093_v40, %v164_v21  ;;  %v1338_v13 = vadd.f32 1e-07, %v1277_v27 }
  0x93   :  { %v666_v31 = vmax.f32 %v664_v12, %v665_v22  ;;  %v677_v32 = vrot.slane %v676_v25, 2  ;;  %v172_v33 = vmul.f32 0.5, %v171_v11  ;;  %v179_v36 = vrot.slane %v1322_v19, 4 }
  0x94   :  { %v672_v37 = vmax.f32 %v670_v18, %v671_v28  ;;  %v683_v38 = vrot.slane %v682_v29, 2  ;;  %v185_v14 = vrot.slane %v1328_v26, 4  ;;  %v851_v41 = vperm.slane %v843_v20, 3 }
  0x95   :  { %v173_v39 = vsub.f32 1.5, %v172_v33  ;;  %v852_v40 = vperm.slane %v844_v23, 3  ;;  %v854_v27 = vmul.f32 %v1272_v24, %v1258_v15  ;;  %v678_v42 = vmax.f32 %v676_v25, %v677_v32 }
  0x96   :  { %vm176_vm13 = vweird.f32 %v1287_v44  ;;  %v191_v43 = vrot.slane %v1335_v30, 4  ;;  %1096 = vrsqrt.f32 %v1338_v13  ;;  %v667_v45 = vrot.slane %v666_v31, 1 }
  0x97   :  { %v684_v46 = vmax.f32 %v682_v29, %v683_v38  ;;  %v174_v47 = vmul.f32 %v1287_v44, %v173_v39  ;;  %v180_v48 = vmax.f32 %v1322_v19, %v179_v36  ;;  %v673_v20 = vrot.slane %v672_v37, 1  ;;  %v355_v29 = vpop.permute.xlu0 %354 }
  0x98   :  { %vm175_vm14 = vweird.f32 %v1261_v16  ;;  %v186_v23 = vmax.f32 %v1328_v26, %v185_v14  ;;  %v855_v24 = vmul.f32 %v851_v41, %v1258_v15  ;;  %v856_v49 = vmul.f32 %v852_v40, %v1258_v15 }
  0x99   :  { %vm177_vm15 = vmor %vm175_vm14, %vm176_vm13  ;;  %v679_v50 = vrot.slane %v678_v42, 1  ;;  %v192_v52 = vmax.f32 %v1335_v30, %v191_v43  ;;  %v858_v53 = vmul.f32 %v854_v27, %v854_v27  ;;  %v668_v54 = vmax.f32 %v666_v31, %v667_v45 }
  0x9a   :  { %v1358_v51 = vsel %vm177_vm15, %v1287_v44, %v174_v47  ;;  %v685_v55 = vrot.slane %v684_v46, 1  ;;  %v181_v56 = vrot.slane %v180_v48, 2  ;;  %v674_v58 = vmax.f32 %v672_v37, %v673_v20 }
  0x9b   :  { %v187_v16 = vrot.slane %v186_v23, 2  ;;  %v197_v59 = vrot.slane %v1358_v51, 4  ;;  %v859_v61 = vmul.f32 %v855_v24, %v855_v24  ;;  %v680_v62 = vmax.f32 %v678_v42, %v679_v50 }
  0x9c   :  { %v1097_v57 = vpop.eup %1096  ;;  %v193_v63 = vrot.slane %v192_v52, 2  ;;  %v860_v1 = vmul.f32 %v856_v49, %v856_v49  ;;  %v1362_v15 = vadd.f32 1e-07, %v858_v53  ;;  %v1364_v2 = vmax.f32 %v684_v46, %v685_v55 }
  0x9d   :  { %v687_v44 = vsub.f32 %v1296_v60, %v668_v54  ;;  %v182_v3 = vmax.f32 %v180_v48, %v181_v56  ;;  %v866_v5 = vmul.f32 %v1097_v57, %v1338_v13  ;;  %v688_v6 = vsub.f32 %v1301_v0, %v674_v58 }
  0x9e   :  { %v188_v8 = vmax.f32 %v186_v23, %v187_v16  ;;  %v357_v12 = vperm.slane %v1228_v34, 1  ;;  %v358_v7 = vperm.slane %v1228_v34, 5  ;;  %v198_v17 = vmax.f32 %v1358_v51, %v197_v59 }
  0x9f   :  { %v1372_v18 = vadd.f32 1e-07, %v859_v61  ;;  %v867_v9 = vmul.f32 %v1097_v57, %v866_v5  ;;  %v359_v21 = vperm.slane %v1230_v35, 1  ;;  %v689_v22 = vsub.f32 %v1307_v4, %v680_v62 }
  0xa0   :  { %v194_v60 = vmax.f32 %v192_v52, %v193_v63  ;;  %v1376_v25 = vadd.f32 1e-07, %v860_v1  ;;  %1098 = vrsqrt.f32 %v1362_v15  ;;  %v690_v0 = vsub.f32 %v1313_v10, %v1364_v2 }
  0xa1   :  { %v691_v11 = vmul.f32 1.442695, %v687_v44  ;;  %v183_v28 = vrot.slane %v182_v3, 1  ;;  %v868_v34 = vmul.f32 0.5, %v867_v9  ;;  %v693_v31 = vmul.f32 1.442695, %v688_v6 }
  0xa2   :  { %v189_v32 = vrot.slane %v188_v8, 1  ;;  %v360_v33 = vperm.slane %v1230_v35, 5  ;;  %v365_v36 = vperm.slane %v357_v12, 1  ;;  %v199_v37 = vrot.slane %v198_v17, 2 }
  0xa3   :  { %v869_v38 = vsub.f32 1.5, %v868_v34  ;;  %vm872_vm0 = vweird.f32 %v1097_v57  ;;  %v366_v4 = vperm.slane %v358_v7, 1  ;;  %1100 = vrsqrt.f32 %v1372_v18 }
  0xa4   :  { %v367_v14 = vperm.slane %v359_v21, 1  ;;  %v368_v39 = vperm.slane %v360_v33, 1  ;;  %v369_v41 = vmul.f32 %v365_v36, %v355_v29  ;;  %vm871_vm1 = vweird.f32 %v1338_v13 }
  0xa5   :  { %v870_v40 = vmul.f32 %v1097_v57, %v869_v38  ;;  %1102 = vrsqrt.f32 %v1376_v25  ;;  %v370_v10 = vmul.f32 %v366_v4, %v355_v29  ;;  %v195_v42 = vrot.slane %v194_v60, 1  ;;  %vm873_vm2 = vmor %vm871_vm1, %vm872_vm0 }
  0xa6   :  { %v1099_v27 = vpop.eup %1098  ;;  %v371_v35 = vmul.f32 %v367_v14, %v355_v29  ;;  %v372_v43 = vmul.f32 %v368_v39, %v355_v29  ;;  %v373_v45 = vmul.f32 %v369_v41, %v369_v41  ;;  %1104 = vpow2.f32 %v691_v11 }
  0xa7   :  { %v1385_v46 = vmul.f32 1.442695, %v689_v22  ;;  %v1387_v47 = vsel %vm873_vm2, %v1097_v57, %v870_v40  ;;  %v876_v48 = vmul.f32 %v1099_v27, %v1362_v15  ;;  %v200_v20 = vmax.f32 %v198_v17, %v199_v37 }
  0xa8   :  { %v905_v23 = vrot.slane %v1387_v47, 4  ;;  %v374_v13 = vmul.f32 %v370_v10, %v370_v10  ;;  %v375_v24 = vmul.f32 %v371_v35, %v371_v35  ;;  %v184_v49 = vmax.f32 %v182_v3, %v183_v28 }
  0xa9   :  { %v877_v50 = vmul.f32 %v1099_v27, %v876_v48  ;;  %v376_v52 = vmul.f32 %v372_v43, %v372_v43  ;;  %v1391_v53 = vadd.f32 1e-07, %v373_v45  ;;  %v1101_v54 = vpop.eup %1100  ;;  %1106 = vpow2.f32 %v693_v31 }
  0xaa   :  { %v190_v55 = vmax.f32 %v188_v8, %v189_v32  ;;  %v1393_v56 = vadd.f32 1e-07, %v374_v13  ;;  %v1395_v58 = vadd.f32 1e-07, %v375_v24  ;;  %v196_v16 = vmax.f32 %v194_v60, %v195_v42 }
  0xab   :  { %v1103_v57 = vpop.eup %1102  ;;  %v878_v59 = vmul.f32 0.5, %v877_v50  ;;  %v886_v61 = vmul.f32 %v1101_v54, %v1372_v18  ;;  %1108 = vrsqrt.f32 %v1391_v53  ;;  %v201_v62 = vrot.slane %v200_v20, 1 }
  0xac   :  { %vm882_vm3 = vweird.f32 %v1099_v27  ;;  %v896_v63 = vmul.f32 %v1103_v57, %v1376_v25  ;;  %v906_v1 = vmax.f32 %v1387_v47, %v905_v23  ;;  %v1401_v2 = vpop.eup %1104  ;;  %v1403_v5 = vadd.f32 1e-07, %v376_v52 }
  0xad   :  { %v879_v44 = vsub.f32 1.5, %v878_v59  ;;  %v887_v3 = vmul.f32 %v1101_v54, %v886_v61  ;;  %1110 = vrsqrt.f32 %v1393_v56  ;;  %v1406_v6 = vmul.f32 1.442695, %v690_v0 }
  0xae   :  { %v203_v8 = vsub.f32 %v1322_v19, %v184_v49  ;;  %v897_v12 = vmul.f32 %v1103_v57, %v896_v63  ;;  %1112 = vrsqrt.f32 %v1395_v58  ;;  %v204_v7 = vsub.f32 %v1328_v26, %v190_v55 }
  0xaf   :  { %v880_v17 = vmul.f32 %v1099_v27, %v879_v44  ;;  %vm881_vm4 = vweird.f32 %v1362_v15  ;;  %v888_v9 = vmul.f32 0.5, %v887_v3  ;;  %v1412_v21 = vpop.eup %1106  ;;  %v202_v22 = vmax.f32 %v200_v20, %v201_v62 }
  0xb0   :  { %v205_v60 = vsub.f32 %v1335_v30, %v196_v16  ;;  %vm883_vm5 = vmor %vm881_vm4, %vm882_vm3  ;;  %v898_v0 = vmul.f32 0.5, %v897_v12  ;;  %v907_v11 = vrot.slane %v906_v1, 2  ;;  %vm892_vm6 = vweird.f32 %v1101_v54 }
  0xb1   :  { %v1109_v28 = vpop.eup %1108  ;;  %v1416_v19 = vsel %vm883_vm5, %v1099_v27, %v880_v17  ;;  %v889_v34 = vsub.f32 1.5, %v888_v9  ;;  %1114 = vrsqrt.f32 %v1403_v5  ;;  %v207_v26 = vmul.f32 1.442695, %v203_v8 }
  0xb2   :  { %v899_v29 = vsub.f32 1.5, %v898_v0  ;;  %v911_v15 = vrot.slane %v1416_v19, 4  ;;  %v382_v31 = vmul.f32 %v1109_v28, %v1391_v53  ;;  %v209_v33 = vmul.f32 1.442695, %v204_v7 }
  0xb3   :  { %v1111_v32 = vpop.eup %1110  ;;  %v890_v30 = vmul.f32 %v1101_v54, %v889_v34  ;;  %vm891_vm7 = vweird.f32 %v1372_v18  ;;  %vm902_vm8 = vweird.f32 %v1103_v57  ;;  %v206_v37 = vsub.f32 %v1358_v51, %v202_v22 }
  0xb4   :  { %v1113_v36 = vpop.eup %1112  ;;  %vm893_vm10 = vmor %vm891_vm7, %vm892_vm6  ;;  %v900_v38 = vmul.f32 %v1103_v57, %v899_v29  ;;  %v908_v4 = vmax.f32 %v906_v1, %v907_v11  ;;  %v383_v14 = vmul.f32 %v1109_v28, %v382_v31  ;;  %vm901_vm9 = vweird.f32 %v1376_v25  ;;  %v64_v11 = vld [vmem:[%s2107_s4] ss:$4 sm:$0x3]  ;;  %v1047_v31 = vld [vmem:[%s2107_s4 + $0x8] ss:$4 sm:$0x3] }
  0xb5   :  { %v1423_v39 = vsel %vm893_vm10, %v1101_v54, %v890_v30  ;;  %v392_v41 = vmul.f32 %v1111_v32, %v1393_v56  ;;  %v402_v40 = vmul.f32 %v1113_v36, %v1395_v58  ;;  %1116 = vpow2.f32 %v207_v26  ;;  %vm903_vm11 = vmor %vm901_vm9, %vm902_vm8 }
  0xb6   :  { %v211_v10 = vmul.f32 1.442695, %v205_v60  ;;  %v912_v18 = vmax.f32 %v1416_v19, %v911_v15  ;;  %v917_v27 = vrot.slane %v1423_v39, 4  ;;  %v1432_v42 = vsel %vm903_vm11, %v1103_v57, %v900_v38 }
  0xb7   :  { %v1430_v51 = vpop.eup %1114  ;;  %v384_v35 = vmul.f32 0.5, %v383_v14  ;;  %v393_v43 = vmul.f32 %v1111_v32, %v392_v41  ;;  %v403_v45 = vmul.f32 %v1113_v36, %v402_v40  ;;  %v213_v48 = vmul.f32 1.442695, %v206_v37 }
  0xb8   :  { %v909_v25 = vrot.slane %v908_v4, 1  ;;  %vm387_vm12 = vweird.f32 %v1391_v53  ;;  %vm388_vm13 = vweird.f32 %v1109_v28  ;;  %v918_v20 = vmax.f32 %v1423_v39, %v917_v27 }
  0xb9   :  { %v385_v23 = vsub.f32 1.5, %v384_v35  ;;  %v394_v13 = vmul.f32 0.5, %v393_v43  ;;  %v404_v24 = vmul.f32 0.5, %v403_v45  ;;  %v913_v49 = vrot.slane %v912_v18, 2  ;;  %vm389_vm0 = vmor %vm387_vm12, %vm388_vm13  ;;  %v70_v43 = vpop.permute.xlu2 %69 }
  0xba   :  { %v923_v50 = vrot.slane %v1432_v42, 4  ;;  %vm398_vm14 = vweird.f32 %v1111_v32  ;;  %v412_v52 = vmul.f32 %v1430_v51, %v1403_v5  ;;  %vm408_vm15 = vweird.f32 %v1113_v36 }
  0xbb   :  { %v386_v54 = vmul.f32 %v1109_v28, %v385_v23  ;;  %v395_v55 = vsub.f32 1.5, %v394_v13  ;;  %v405_v57 = vsub.f32 1.5, %v404_v24  ;;  %v1439_v16 = vpop.eup %1116  ;;  %v910_v59 = vmax.f32 %v908_v4, %v909_v25 }
  0xbc   :  { %vm397_vm1 = vweird.f32 %v1393_v56  ;;  %vm407_vm2 = vweird.f32 %v1395_v58  ;;  %v413_v61 = vmul.f32 %v1430_v51, %v412_v52  ;;  %v919_v62 = vrot.slane %v918_v20, 2 }
  0xbd   :  { %v1447_v63 = vsel %vm389_vm0, %v1109_v28, %v386_v54  ;;  %v396_v1 = vmul.f32 %v1111_v32, %v395_v55  ;;  %vm399_vm3 = vmor %vm397_vm1, %vm398_vm14  ;;  %v406_v44 = vmul.f32 %v1113_v36, %v405_v57  ;;  %1118 = vpow2.f32 %v209_v33 }
  0xbe   :  { %v924_v3 = vmax.f32 %v1432_v42, %v923_v50  ;;  %vm409_vm4 = vmor %vm407_vm2, %vm408_vm15  ;;  %v414_v8 = vmul.f32 0.5, %v413_v61  ;;  %v421_v53 = vrot.slane %v1447_v63, 4  ;;  %1120 = vpow2.f32 %v211_v10 }
  0xbf   :  { %v914_v56 = vmax.f32 %v912_v18, %v913_v49  ;;  %v1452_v12 = vsel %vm399_vm3, %v1111_v32, %v396_v1  ;;  %v1454_v58 = vsel %vm409_vm4, %v1113_v36, %v406_v44  ;;  %v929_v7 = vsub.f32 %v1387_v47, %v910_v59 }
  0xc0   :  { %v415_v17 = vsub.f32 1.5, %v414_v8  ;;  %vm418_vm5 = vweird.f32 %v1430_v51  ;;  %v422_v9 = vmax.f32 %v1447_v63, %v421_v53  ;;  %1122 = vpow2.f32 %v213_v48 }
  0xc1   :  { %v920_v22 = vmax.f32 %v918_v20, %v919_v62  ;;  %v427_v60 = vrot.slane %v1452_v12, 4  ;;  %v433_v0 = vrot.slane %v1454_v58, 4  ;;  %1124 = vpow2.f32 %v1385_v46 }
  0xc2   :  { %v925_v28 = vrot.slane %v924_v3, 2  ;;  %v416_v47 = vmul.f32 %v1430_v51, %v415_v17  ;;  %vm417_vm6 = vweird.f32 %v1403_v5  ;;  %v915_v34 = vrot.slane %v914_v56, 1 }
  0xc3   :  { %vm419_vm7 = vmor %vm417_vm6, %vm418_vm5  ;;  %v423_v26 = vrot.slane %v422_v9, 2  ;;  %v428_v29 = vmax.f32 %v1452_v12, %v427_v60  ;;  %v434_v15 = vmax.f32 %v1454_v58, %v433_v0  ;;  %v1472_v32 = vpop.eup %1118  ;;  %v933_v33 = vmul.f32 1.442695, %v929_v7 }
  0xc4   :  { %v1475_v46 = vsel %vm419_vm7, %v1430_v51, %v416_v47  ;;  %v74_v30 = vperm.slane %v64_v11, 0  ;;  %v75_v36 = vperm.slane %v64_v11, 1  ;;  %v1477_v5 = vpop.eup %1120  ;;  %v921_v37 = vrot.slane %v920_v22, 1 }
  0xc5   :  { %v429_v38 = vrot.slane %v428_v29, 2  ;;  %v435_v4 = vrot.slane %v434_v15, 2  ;;  %v439_v14 = vrot.slane %v1475_v46, 4  ;;  %1126 = vpow2.f32 %v1406_v6 }
  0xc6   :  { %v926_v41 = vmax.f32 %v924_v3, %v925_v28  ;;  %v76_v40 = vperm.slane %v1047_v31, 0  ;;  %v1481_v10 = vpop.eup %1122  ;;  %v916_v18 = vmax.f32 %v914_v56, %v915_v34  ;;  %v424_v27 = vmax.f32 %v422_v9, %v423_v26 }
  0xc7   :  { %v440_v51 = vmax.f32 %v1475_v46, %v439_v14  ;;  %v77_v35 = vperm.slane %v1047_v31, 1  ;;  %v1484_v45 = vpop.eup %1124  ;;  %1128 = vpow2.f32 %v933_v33  ;;  %v430_v48 = vmax.f32 %v428_v29, %v429_v38 }
  0xc8   :  { %v82_v25 = vsub.f32 %v70_v43, %v74_v30  ;;  %v83_v20 = vsub.f32 %v70_v43, %v75_v36  ;;  %v922_v23 = vmax.f32 %v920_v22, %v921_v37  ;;  %v436_v13 = vmax.f32 %v434_v15, %v435_v4 }
  0xc9   :  { %v441_v24 = vrot.slane %v440_v51, 2  ;;  %v215_v6 = vrot.slane %v1439_v16, 4  ;;  %v927_v49 = vrot.slane %v926_v41, 1  ;;  %v221_v50 = vrot.slane %v1472_v32, 4 }
  0xca   :  { %v227_v52 = vrot.slane %v1477_v5, 4  ;;  %v233_v54 = vrot.slane %v1481_v10, 4  ;;  %v930_v55 = vsub.f32 %v1416_v19, %v916_v18  ;;  %v425_v57 = vrot.slane %v424_v27, 1 }
  0xcb   :  { %v442_v59 = vmax.f32 %v440_v51, %v441_v24  ;;  %v216_v61 = vadd.f32 %v1439_v16, %v215_v6  ;;  %v1492_v62 = vpop.eup %1126  ;;  %v431_v1 = vrot.slane %v430_v48, 1  ;;  %v222_v44 = vadd.f32 %v1472_v32, %v221_v50 }
  0xcc   :  { %v228_v3 = vadd.f32 %v1477_v5, %v227_v52  ;;  %v234_v8 = vadd.f32 %v1481_v10, %v233_v54  ;;  %v931_v53 = vsub.f32 %v1423_v39, %v922_v23  ;;  %v437_v56 = vrot.slane %v436_v13, 1 }
  0xcd   :  { %v84_v7 = vsub.f32 %v70_v43, %v76_v40  ;;  %v217_v17 = vrot.slane %v216_v61, 2  ;;  %v1498_v9 = vpop.eup %1128  ;;  %v928_v19 = vmax.f32 %v926_v41, %v927_v49  ;;  %v223_v22 = vrot.slane %v222_v44, 2 }
  0xce   :  { %v229_v60 = vrot.slane %v228_v3, 2  ;;  %v235_v0 = vrot.slane %v234_v8, 2  ;;  %v935_v11 = vmul.f32 1.442695, %v930_v55  ;;  %v426_v28 = vmax.f32 %v424_v27, %v425_v57  ;;  %v102_v57 = vpop.permute.xlu1 %101 }
  0xcf   :  { %v443_v47 = vrot.slane %v442_v59, 1  ;;  %v218_v34 = vadd.f32 %v217_v17, %v216_v61  ;;  %v432_v26 = vmax.f32 %v430_v48, %v431_v1  ;;  %v224_v29 = vadd.f32 %v223_v22, %v222_v44  ;;  %v1048_v1 = vld [vmem:[%s2107_s4 + $0x1] ss:$4 sm:$0x3] }
  0xd0   :  { %v230_v15 = vadd.f32 %v229_v60, %v228_v3  ;;  %v236_v31 = vadd.f32 %v235_v0, %v234_v8  ;;  %v937_v33 = vmul.f32 1.442695, %v931_v53  ;;  %v438_v30 = vmax.f32 %v436_v13, %v437_v56  ;;  %v1049_v60 = vld [vmem:[%s2107_s4 + $0x9] ss:$4 sm:$0x3] }
  0xd1   :  { %v85_v39 = vsub.f32 %v70_v43, %v77_v35  ;;  %v219_v36 = vrot.slane %v218_v34, 1  ;;  %v932_v37 = vsub.f32 %v1432_v42, %v928_v19  ;;  %v225_v38 = vrot.slane %v224_v29, 1 }
  0xd2   :  { %v231_v4 = vrot.slane %v230_v15, 1  ;;  %v237_v14 = vrot.slane %v236_v31, 1  ;;  %v444_v41 = vmax.f32 %v442_v59, %v443_v47  ;;  %v445_v40 = vsub.f32 %v1447_v63, %v426_v28  ;;  %v93_v63 = vpop.permute.xlu2 %92 }
  0xd3   :  { %v86_v18 = vmul.f32 %v82_v25, %v82_v25  ;;  %v1502_v27 = vadd.f32 %v219_v36, %v218_v34  ;;  %1130 = vpow2.f32 %v935_v11  ;;  %v446_v51 = vsub.f32 %v1452_v12, %v432_v26 }
  0xd4   :  { %v1505_v48 = vadd.f32 %v225_v38, %v224_v29  ;;  %v1507_v23 = vadd.f32 %v231_v4, %v230_v15  ;;  %1132 = vpow2.f32 %v937_v33  ;;  %v447_v35 = vsub.f32 %v1454_v58, %v438_v30  ;;  %v1564_v38 = vld [vmem:[%s2107_s4 + $0x3] ss:$4 sm:$0x3] }
  0xd5   :  { %v87_v42 = vmul.f32 %v83_v20, %v83_v20  ;;  %v1510_v43 = vadd.f32 %v237_v14, %v236_v31  ;;  %v939_v13 = vmul.f32 1.442695, %v932_v37  ;;  %v88_v24 = vmul.f32 %v84_v7, %v84_v7 }
  0xd6   :  { %v89_v6 = vmul.f32 %v85_v39, %v85_v39  ;;  %1134 = vrcp.f32 %v1502_v27  ;;  %v448_v25 = vsub.f32 %v1475_v46, %v444_v41  ;;  %v449_v49 = vmul.f32 1.442695, %v445_v40 }
  0xd7   :  { %1136 = vrcp.f32 %v1505_v48  ;;  %v451_v12 = vmul.f32 1.442695, %v446_v51  ;;  %v453_v50 = vmul.f32 1.442695, %v447_v35  ;;  %v95_v52 = vadd.f32 %v93_v63, %v86_v18 }
  0xd8   :  { %1138 = vrcp.f32 %v1507_v23  ;;  %v96_v58 = vadd.f32 %v93_v63, %v87_v42  ;;  %v97_v54 = vadd.f32 %v93_v63, %v88_v24  ;;  %v98_v55 = vadd.f32 %v93_v63, %v89_v6 }
  0xd9   :  { %1140 = vrcp.f32 %v1510_v43  ;;  %v1517_v20 = vpop.eup %1130  ;;  %v455_v46 = vmul.f32 1.442695, %v448_v25  ;;  %v1530_v8 = vmul.f32 %v102_v57, %v95_v52  ;;  %v250_v7 = vand.u32 2147483648, %v1502_v27 }
  0xda   :  { %1142 = vpow2.f32 %v939_v13  ;;  %v1519_v59 = vpop.eup %1132  ;;  %v1532_v53 = vmul.f32 %v102_v57, %v96_v58  ;;  %v1539_v19 = vmul.f32 %v102_v57, %v97_v54  ;;  %v1541_v22 = vmul.f32 %v102_v57, %v98_v55  ;;  %v317_v51 = vpop.permute.xlu2 %316 }
  0xdb   :  { %1144 = vpow2.f32 %v449_v49  ;;  %v265_v11 = vand.u32 2147483648, %v1505_v48  ;;  %v321_v47 = vperm.slane %v1048_v1, 0  ;;  %v248_v26 = vand.u32 2147483647, %v1502_v27 }
  0xdc   :  { %v1521_v61 = vpop.eup %1134  ;;  %1146 = vpow2.f32 %v451_v12  ;;  %v280_v29 = vand.u32 2147483648, %v1507_v23  ;;  %v322_v31 = vperm.slane %v1048_v1, 1  ;;  %vm244_vm8 = vweird.f32 %v1502_v27 }
  0xdd   :  { %v1526_v44 = vpop.eup %1136  ;;  %1148 = vpow2.f32 %v453_v50  ;;  %v240_v3 = vmul.f32 %v1521_v61, %v1502_v27  ;;  %v295_v36 = vand.u32 2147483648, %v1510_v43  ;;  %v323_v37 = vperm.slane %v1049_v60, 0 }
  0xde   :  { %v1534_v56 = vpop.eup %1138  ;;  %v255_v17 = vmul.f32 %v1526_v44, %v1505_v48  ;;  %1150 = vpow2.f32 %v455_v46  ;;  %v1568_v14 = vor.u32 1.1754944e-38, %v250_v7  ;;  %vm259_vm10 = vweird.f32 %v1505_v48 }
  0xdf   :  { %v1546_v0 = vpop.eup %1140  ;;  %v270_v28 = vmul.f32 %v1534_v56, %v1507_v23  ;;  %v241_v30 = vsub.f32 1.0, %v240_v3  ;;  %v263_v41 = vand.u32 2147483647, %v1505_v48  ;;  %v1574_v42 = vor.u32 1.1754944e-38, %v265_v11 }
  0xe0   :  { %v1551_v34 = vpop.eup %1142  ;;  %v285_v15 = vmul.f32 %v1546_v0, %v1510_v43  ;;  %v256_v39 = vsub.f32 1.0, %v255_v17  ;;  %vm274_vm9 = vweird.f32 %v1507_v23  ;;  %v278_v13 = vand.u32 2147483647, %v1507_v23 }
  0xe1   :  { %v1557_v33 = vpop.eup %1144  ;;  %v271_v40 = vsub.f32 1.0, %v270_v28  ;;  %v324_v24 = vperm.slane %v1049_v60, 1  ;;  %v329_v6 = vsub.f32 %v317_v51, %v321_v47  ;;  %v1578_v63 = vor.u32 1.1754944e-38, %v280_v29 }
  0xe2   :  { %v1566_v4 = vpop.eup %1146  ;;  %v286_v18 = vsub.f32 1.0, %v285_v15  ;;  %vm289_vm11 = vweird.f32 %v1510_v43  ;;  %v293_v25 = vand.u32 2147483647, %v1510_v43  ;;  %v330_v49 = vsub.f32 %v317_v51, %v322_v31 }
  0xe3   :  { %v1572_v35 = vpop.eup %1148  ;;  %v242_v50 = vmul.f32 %v1521_v61, %v241_v30  ;;  %v257_v52 = vmul.f32 %v1526_v44, %v256_v39  ;;  %v296_v58 = vor.u32 1.1754944e-38, %v295_v36  ;;  %v331_v54 = vsub.f32 %v317_v51, %v323_v37 }
  0xe4   :  { %v1582_v12 = vpop.eup %1150  ;;  %v272_v55 = vmul.f32 %v1534_v56, %v271_v40  ;;  %v287_v57 = vmul.f32 %v1546_v0, %v286_v18  ;;  %v805_v46 = vperm.slane %v1564_v38, 0  ;;  %v457_v1 = vrot.slane %v1557_v33, 4 }
  0xe5   :  { %vm245_vm12 = vweird.f32 %v1521_v61  ;;  %vm1591_vm13 = vcmp.eq.f32.partialorder %v248_v26, 8.507059e+37  ;;  %vm1595_vm14 = vcmp.eq.f32.partialorder %v263_v41, 8.507059e+37  ;;  %v332_v17 = vsub.f32 %v317_v51, %v324_v24 }
  0xe6   :  { %v333_v60 = vmul.f32 %v329_v6, %v329_v6  ;;  %v463_v11 = vrot.slane %v1566_v4, 4  ;;  %vm260_vm15 = vweird.f32 %v1526_v44  ;;  %vm275_vm0 = vweird.f32 %v1534_v56  ;;  %vm1619_vm4 = vmor %vm244_vm8, %vm245_vm12 }
  0xe7   :  { %vm1602_vm1 = vcmp.eq.f32.partialorder %v278_v13, 8.507059e+37  ;;  %vm1606_vm2 = vcmp.eq.f32.partialorder %v293_v25, 8.507059e+37  ;;  %v334_v26 = vmul.f32 %v330_v49, %v330_v49  ;;  %v458_v29 = vadd.f32 %v1557_v33, %v457_v1  ;;  %vm1630_vm5 = vmor %vm259_vm10, %vm260_vm15  ;;  %v339_v13 = vpop.permute.xlu1 %338 }
  0xe8   :  { %v243_v15 = vadd.f32 %v1521_v61, %v242_v50  ;;  %v258_v31 = vadd.f32 %v1526_v44, %v257_v52  ;;  %vm290_vm3 = vweird.f32 %v1546_v0  ;;  %v464_v30 = vadd.f32 %v1566_v4, %v463_v11  ;;  %vm1639_vm6 = vmor %vm274_vm9, %vm275_vm0  ;;  %v1053_v50 = vld [vmem:[%s2107_s4 + $0xb] ss:$4 sm:$0x3] }
  0xe9   :  { %v273_v36 = vadd.f32 %v1534_v56, %v272_v55  ;;  %v288_v37 = vadd.f32 %v1546_v0, %v287_v57  ;;  %v459_v41 = vrot.slane %v458_v29, 2  ;;  %v469_v40 = vrot.slane %v1572_v35, 4  ;;  %vm1657_vm7 = vmor %vm289_vm11, %vm290_vm3 }
  0xea   :  { %v335_v27 = vmul.f32 %v331_v54, %v331_v54  ;;  %v336_v51 = vmul.f32 %v332_v17, %v332_v17  ;;  %v465_v24 = vrot.slane %v464_v30, 2  ;;  %v475_v6 = vrot.slane %v1582_v12, 4 }
  0xeb   :  { %v341_v49 = vadd.f32 %v339_v13, %v333_v60  ;;  %v342_v48 = vadd.f32 %v339_v13, %v334_v26  ;;  %v460_v52 = vadd.f32 %v459_v41, %v458_v29  ;;  %v470_v54 = vadd.f32 %v1572_v35, %v469_v40 }
  0xec   :  { %v247_v55 = vsel %vm1619_vm4, %v1521_v61, %v243_v15  ;;  %v262_v23 = vsel %vm1630_vm5, %v1526_v44, %v258_v31  ;;  %v466_v1 = vadd.f32 %v465_v24, %v464_v30  ;;  %v476_v17 = vadd.f32 %v1582_v12, %v475_v6 }
  0xed   :  { %v277_v60 = vsel %vm1639_vm6, %v1534_v56, %v273_v36  ;;  %v292_v61 = vsel %vm1657_vm7, %v1546_v0, %v288_v37  ;;  %v461_v44 = vrot.slane %v460_v52, 1  ;;  %v471_v11 = vrot.slane %v470_v54, 2 }
  0xee   :  { %v806_v26 = vperm.slane %v1564_v38, 1  ;;  %v807_v43 = vperm.slane %v1053_v50, 0  ;;  %v467_v29 = vrot.slane %v466_v1, 1  ;;  %v477_v15 = vrot.slane %v476_v17, 2 }
  0xef   :  { %v252_v31 = vsel %vm1591_vm13, %v1568_v14, %v247_v55  ;;  %v267_v30 = vsel %vm1595_vm14, %v1574_v42, %v262_v23  ;;  %v1675_v56 = vadd.f32 %v461_v44, %v460_v52  ;;  %v472_v39 = vadd.f32 %v471_v11, %v470_v54 }
  0xf0   :  { %v282_v0 = vsel %vm1602_vm1, %v1578_v63, %v277_v60  ;;  %v297_v36 = vsel %vm1606_vm2, %v296_v58, %v292_v61  ;;  %v1682_v37 = vadd.f32 %v467_v29, %v466_v1  ;;  %v478_v41 = vadd.f32 %v477_v15, %v476_v17  ;;  %v1050_v63 = vld [vmem:[%s2107_s4 + $0x2] ss:$4 sm:$0x3] }
  0xf1   :  { %v343_v40 = vadd.f32 %v339_v13, %v335_v27  ;;  %v808_v3 = vperm.slane %v1053_v50, 1  ;;  %v473_v14 = vrot.slane %v472_v39, 1  ;;  %1152 = vrcp.f32 %v1675_v56  ;;  %v801_v27 = vpop.permute.xlu2 %800 }
  0xf2   :  { %v299_v42 = vmul.f32 %v1439_v16, %v252_v31  ;;  %v344_v7 = vadd.f32 %v339_v13, %v336_v51  ;;  %v479_v18 = vrot.slane %v478_v41, 1  ;;  %1154 = vrcp.f32 %v1682_v37  ;;  %v1051_v16 = vld [vmem:[%s2107_s4 + $0xa] ss:$4 sm:$0x3] }
  0xf3   :  { %v300_v58 = vmul.f32 %v1472_v32, %v267_v30  ;;  %v301_v28 = vmul.f32 %v1477_v5, %v282_v0  ;;  %v302_v47 = vmul.f32 %v1481_v10, %v297_v36  ;;  %v1693_v24 = vadd.f32 %v473_v14, %v472_v39  ;;  %v347_v5 = vpop.permute.xlu1 %346 }
  0xf4   :  { %v1700_v51 = vsub.f32 %v801_v27, %v805_v46  ;;  %v1702_v13 = vsub.f32 %v801_v27, %v806_v26  ;;  %v1704_v6 = vsub.f32 %v801_v27, %v807_v43  ;;  %v1706_v32 = vadd.f32 %v479_v18, %v478_v41 }
  0xf5   :  { %v1708_v25 = vsub.f32 %v801_v27, %v808_v3  ;;  %1156 = vrcp.f32 %v1693_v24  ;;  %v563_v10 = vperm.slane %v1050_v63, 0  ;;  %v564_v50 = vperm.slane %v1050_v63, 1 }
  0xf6   :  { %v1712_v52 = vmul.f32 %v299_v42, %v1530_v8  ;;  %1158 = vrcp.f32 %v1706_v32  ;;  %v565_v38 = vperm.slane %v1051_v16, 0  ;;  %v566_v46 = vperm.slane %v1051_v16, 1 }
  0xf7   :  { %v1715_v54 = vpop.eup %1152  ;;  %v1718_v55 = vmul.f32 %v300_v58, %v1532_v53  ;;  %v1721_v23 = vmul.f32 %v301_v28, %v1539_v19  ;;  %v1724_v57 = vmul.f32 %v302_v47, %v1541_v22  ;;  %v1726_v1 = vmul.f32 %v347_v5, %v341_v49  ;;  %v559_v53 = vpop.permute.xlu0 %558 }
  0xf8   :  { %v1728_v17 = vpop.eup %1154  ;;  %v482_v8 = vmul.f32 %v1715_v54, %v1675_v56  ;;  %v1732_v60 = vmul.f32 %v347_v5, %v342_v48  ;;  %v1734_v61 = vmul.f32 %v347_v5, %v343_v40  ;;  %v1736_v44 = vmul.f32 %v347_v5, %v344_v7 }
  0xf9   :  { %v490_v19 = vand.u32 2147483647, %v1675_v56  ;;  %v497_v22 = vmul.f32 %v1728_v17, %v1682_v37  ;;  %v571_v11 = vsub.f32 %v559_v53, %v563_v10  ;;  %v1741_v49 = vsub.f32 %v559_v53, %v564_v50 }
  0xfa   :  { %v483_v26 = vsub.f32 1.0, %v482_v8  ;;  %v492_v43 = vand.u32 2147483648, %v1675_v56  ;;  %v1744_v29 = vsub.f32 %v559_v53, %v565_v38  ;;  %v1746_v48 = vsub.f32 %v559_v53, %v566_v46 }
  0xfb   :  { %v1748_v15 = vpop.eup %1156  ;;  %v498_v31 = vsub.f32 1.0, %v497_v22  ;;  %v505_v30 = vand.u32 2147483647, %v1682_v37  ;;  %v699_v39 = vrot.slane %v1401_v2, 4  ;;  %v705_v0 = vrot.slane %v1412_v21, 4 }
  0xfc   :  { %v1753_v36 = vpop.eup %1158  ;;  %v484_v41 = vmul.f32 %v1715_v54, %v483_v26  ;;  %vm486_vm8 = vweird.f32 %v1675_v56  ;;  %v507_v40 = vand.u32 2147483648, %v1682_v37  ;;  %v512_v3 = vmul.f32 %v1748_v15, %v1693_v24 }
  0xfd   :  { %vm1760_vm10 = vcmp.eq.f32.partialorder %v490_v19, 8.507059e+37  ;;  %v499_v42 = vmul.f32 %v1728_v17, %v498_v31  ;;  %vm501_vm9 = vweird.f32 %v1682_v37  ;;  %v527_v7 = vmul.f32 %v1753_v36, %v1706_v32 }
  0xfe   :  { %vm487_vm11 = vweird.f32 %v1715_v54  ;;  %v493_v18 = vor.u32 1.1754944e-38, %v492_v43  ;;  %v513_v63 = vsub.f32 1.0, %v512_v3  ;;  %v1769_v58 = vmul.f32 %v571_v11, %v571_v11 }
  0xff   :  { %v485_v28 = vadd.f32 %v1715_v54, %v484_v41  ;;  %vm1772_vm12 = vcmp.eq.f32.partialorder %v505_v30, 8.507059e+37  ;;  %v528_v27 = vsub.f32 1.0, %v527_v7  ;;  %v700_v16 = vadd.f32 %v1401_v2, %v699_v39  ;;  %vm1788_vm15 = vmor %vm486_vm8, %vm487_vm11 }
 0x100   :  { %v706_v5 = vadd.f32 %v1412_v21, %v705_v0  ;;  %v508_v10 = vor.u32 1.1754944e-38, %v507_v40  ;;  %v514_v50 = vmul.f32 %v1748_v15, %v513_v63  ;;  %v711_v38 = vrot.slane %v1484_v45, 4 }
 0x101   :  { %v717_v46 = vrot.slane %v1492_v62, 4  ;;  %v500_v8 = vadd.f32 %v1728_v17, %v499_v42  ;;  %vm502_vm13 = vweird.f32 %v1728_v17  ;;  %vm516_vm14 = vweird.f32 %v1693_v24 }
 0x102   :  { %v701_v53 = vrot.slane %v700_v16, 2  ;;  %v520_v22 = vand.u32 2147483647, %v1693_v24  ;;  %v522_v11 = vand.u32 2147483648, %v1693_v24  ;;  %v529_v26 = vmul.f32 %v1753_v36, %v528_v27  ;;  %vm1802_vm1 = vmor %vm501_vm9, %vm502_vm13 }
 0x103   :  { %v707_v43 = vrot.slane %v706_v5, 2  ;;  %v489_v31 = vsel %vm1788_vm15, %v1715_v54, %v485_v28  ;;  %vm531_vm0 = vweird.f32 %v1706_v32  ;;  %v712_v56 = vadd.f32 %v1484_v45, %v711_v38 }
 0x104   :  { %v702_v30 = vadd.f32 %v701_v53, %v700_v16  ;;  %v515_v0 = vadd.f32 %v1748_v15, %v514_v50  ;;  %vm517_vm2 = vweird.f32 %v1748_v15  ;;  %v718_v40 = vadd.f32 %v1492_v62, %v717_v46 }
 0x105   :  { %v708_v41 = vadd.f32 %v707_v43, %v706_v5  ;;  %v504_v54 = vsel %vm1802_vm1, %v1728_v17, %v500_v8  ;;  %vm532_vm3 = vweird.f32 %v1753_v36  ;;  %v537_v3 = vand.u32 2147483648, %v1706_v32  ;;  %vm1819_vm4 = vmor %vm516_vm14, %vm517_vm2 }
 0x106   :  { %v703_v37 = vrot.slane %v702_v30, 1  ;;  %v494_v42 = vsel %vm1760_vm10, %v493_v18, %v489_v31  ;;  %v530_v7 = vadd.f32 %v1753_v36, %v529_v26  ;;  %v713_v28 = vrot.slane %v712_v56, 2  ;;  %vm1841_vm6 = vmor %vm531_vm0, %vm532_vm3  ;;  %v823_v26 = vpop.permute.xlu1 %822 }
 0x107   :  { %v709_v63 = vrot.slane %v708_v41, 1  ;;  %vm1823_vm5 = vcmp.eq.f32.partialorder %v520_v22, 8.507059e+37  ;;  %v535_v16 = vand.u32 2147483647, %v1706_v32  ;;  %v719_v14 = vrot.slane %v718_v40, 2 }
 0x108   :  { %v1828_v5 = vadd.f32 %v703_v37, %v702_v30  ;;  %v509_v18 = vsel %vm1772_vm12, %v508_v10, %v504_v54  ;;  %v519_v24 = vsel %vm1819_vm4, %v1748_v15, %v515_v0  ;;  %v714_v38 = vadd.f32 %v713_v28, %v712_v56 }
 0x109   :  { %v1835_v50 = vadd.f32 %v709_v63, %v708_v41  ;;  %v523_v46 = vor.u32 1.1754944e-38, %v522_v11  ;;  %v541_v53 = vmul.f32 %v1557_v33, %v494_v42  ;;  %v720_v47 = vadd.f32 %v719_v14, %v718_v40 }
 0x10a   :  { %1160 = vrcp.f32 %v1828_v5  ;;  %v534_v15 = vsel %vm1841_vm6, %v1753_v36, %v530_v7  ;;  %v538_v10 = vor.u32 1.1754944e-38, %v537_v3  ;;  %v715_v19 = vrot.slane %v714_v38, 1 }
 0x10b   :  { %1162 = vrcp.f32 %v1835_v50  ;;  %v524_v32 = vsel %vm1823_vm5, %v523_v46, %v519_v24  ;;  %v542_v22 = vmul.f32 %v1566_v4, %v509_v18  ;;  %v817_v11 = vmul.f32 %v1700_v51, %v1700_v51 }
 0x10c   :  { %v721_v33 = vrot.slane %v720_v47, 1  ;;  %vm536_vm7 = vcmp.eq.f32.partialorder %v535_v16, 8.507059e+37  ;;  %v818_v43 = vmul.f32 %v1702_v13, %v1702_v13  ;;  %v819_v36 = vmul.f32 %v1704_v6, %v1704_v6 }
 0x10d   :  { %v1860_v31 = vadd.f32 %v715_v19, %v714_v38  ;;  %v539_v30 = vsel %vm536_vm7, %v538_v10, %v534_v15  ;;  %v545_v56 = vmul.f32 %v541_v53, %v1726_v1  ;;  %v820_v4 = vmul.f32 %v1708_v25, %v1708_v25 }
 0x10e   :  { %v1865_v39 = vadd.f32 %v721_v33, %v720_v47  ;;  %v543_v51 = vmul.f32 %v1572_v35, %v524_v32  ;;  %v1870_v0 = vmul.f32 %v1741_v49, %v1741_v49  ;;  %v1874_v13 = vmul.f32 %v1744_v29, %v1744_v29 }
 0x10f   :  { %1164 = vrcp.f32 %v1860_v31  ;;  %v546_v1 = vmul.f32 %v542_v22, %v1732_v60  ;;  %v1882_v25 = vmul.f32 %v1746_v48, %v1746_v48  ;;  %v1884_v41 = vadd.f32 %v823_v26, %v817_v11 }
 0x110   :  { %v1877_v6 = vpop.eup %1160  ;;  %1166 = vrcp.f32 %v1865_v39  ;;  %v544_v49 = vmul.f32 %v1582_v12, %v539_v30  ;;  %v1890_v29 = vadd.f32 %v823_v26, %v818_v43  ;;  %v1892_v40 = vadd.f32 %v823_v26, %v819_v36 }
 0x111   :  { %v1887_v35 = vpop.eup %1162  ;;  %v724_v54 = vmul.f32 %v1877_v6, %v1828_v5  ;;  %v1896_v60 = vadd.f32 %v823_v26, %v820_v4  ;;  %v734_v48 = vand.u32 2147483648, %v1828_v5  ;;  %v1902_v37 = vadd.f32 %v545_v56, %v1712_v52 }
 0x112   :  { %v739_v3 = vmul.f32 %v1887_v35, %v1835_v50  ;;  %v1905_v42 = vmul.f32 %v543_v51, %v1734_v61  ;;  %v732_v7 = vand.u32 2147483647, %v1828_v5  ;;  %v747_v63 = vand.u32 2147483647, %v1835_v50 }
 0x113   :  { %v725_v12 = vsub.f32 1.0, %v724_v54  ;;  %v1910_v27 = vadd.f32 %v546_v1, %v1718_v55  ;;  %v941_v17 = vrot.slane %v1498_v9, 4  ;;  %v947_v16 = vrot.slane %v1517_v20, 4 }
 0x114   :  { %v740_v28 = vsub.f32 1.0, %v739_v3  ;;  %v1917_v52 = vmul.f32 %v544_v49, %v1736_v44  ;;  %vm728_vm8 = vweird.f32 %v1828_v5  ;;  %vm743_vm10 = vweird.f32 %v1835_v50 }
 0x115   :  { %v1914_v14 = vpop.eup %1164  ;;  %v726_v61 = vmul.f32 %v1877_v6, %v725_v12  ;;  %v735_v24 = vor.u32 1.1754944e-38, %v734_v48  ;;  %v749_v38 = vand.u32 2147483648, %v1835_v50  ;;  %vm729_vm9 = vweird.f32 %v1877_v6 }
 0x116   :  { %v1922_v18 = vpop.eup %1166  ;;  %v741_v55 = vmul.f32 %v1887_v35, %v740_v28  ;;  %v754_v46 = vmul.f32 %v1914_v14, %v1860_v31  ;;  %vm1929_vm11 = vcmp.eq.f32.partialorder %v732_v7, 8.507059e+37  ;;  %vm744_vm12 = vweird.f32 %v1887_v35  ;;  %vm1952_vm15 = vmor %vm728_vm8, %vm729_vm9  ;;  %v581_v28 = vpop.permute.xlu2 %580 }
 0x117   :  { %vm1934_vm13 = vcmp.eq.f32.partialorder %v747_v63, 8.507059e+37  ;;  %v769_v53 = vmul.f32 %v1922_v18, %v1865_v39  ;;  %v942_v47 = vadd.f32 %v1498_v9, %v941_v17  ;;  %v727_v15 = vadd.f32 %v1877_v6, %v726_v61  ;;  %vm1966_vm1 = vmor %vm743_vm10, %vm744_vm12 }
 0x118   :  { %v755_v10 = vsub.f32 1.0, %v754_v46  ;;  %v948_v19 = vadd.f32 %v1517_v20, %v947_v16  ;;  %v953_v32 = vrot.slane %v1519_v59, 4  ;;  %v742_v22 = vadd.f32 %v1887_v35, %v741_v55 }
 0x119   :  { %v770_v11 = vsub.f32 1.0, %v769_v53  ;;  %v943_v33 = vrot.slane %v942_v47, 2  ;;  %v959_v26 = vrot.slane %v1551_v34, 4  ;;  %v750_v43 = vor.u32 1.1754944e-38, %v749_v38 }
 0x11a   :  { %v756_v36 = vmul.f32 %v1914_v14, %v755_v10  ;;  %vm758_vm14 = vweird.f32 %v1860_v31  ;;  %v949_v30 = vrot.slane %v948_v19, 2  ;;  %vm759_vm0 = vweird.f32 %v1914_v14 }
 0x11b   :  { %v762_v4 = vand.u32 2147483647, %v1860_v31  ;;  %v764_v51 = vand.u32 2147483648, %v1860_v31  ;;  %v944_v1 = vadd.f32 %v943_v33, %v942_v47  ;;  %v731_v49 = vsel %vm1952_vm15, %v1877_v6, %v727_v15  ;;  %vm1992_vm4 = vmor %vm758_vm14, %vm759_vm0  ;;  %v589_v47 = vpop.permute.xlu0 %588 }
 0x11c   :  { %v771_v54 = vmul.f32 %v1922_v18, %v770_v11  ;;  %v950_v48 = vadd.f32 %v949_v30, %v948_v19  ;;  %v954_v3 = vadd.f32 %v1519_v59, %v953_v32  ;;  %v746_v12 = vsel %vm1966_vm1, %v1887_v35, %v742_v22 }
 0x11d   :  { %v757_v7 = vadd.f32 %v1914_v14, %v756_v36  ;;  %v945_v6 = vrot.slane %v944_v1, 1  ;;  %v960_v63 = vadd.f32 %v1551_v34, %v959_v26  ;;  %vm773_vm2 = vweird.f32 %v1865_v39 }
 0x11e   :  { %v777_v50 = vand.u32 2147483647, %v1865_v39  ;;  %v951_v17 = vrot.slane %v950_v48, 1  ;;  %v955_v16 = vrot.slane %v954_v3, 2  ;;  %vm774_vm3 = vweird.f32 %v1922_v18 }
 0x11f   :  { %v583_v61 = vadd.f32 %v581_v28, %v1769_v58  ;;  %v584_v55 = vadd.f32 %v581_v28, %v1870_v0  ;;  %v1982_v38 = vadd.f32 %v945_v6, %v944_v1  ;;  %v736_v35 = vsel %vm1929_vm11, %v735_v24, %v731_v49  ;;  %vm2010_vm6 = vmor %vm773_vm2, %vm774_vm3 }
 0x120   :  { %v751_v46 = vsel %vm1934_vm13, %v750_v43, %v746_v12  ;;  %v772_v58 = vadd.f32 %v1922_v18, %v771_v54  ;;  %v1997_v0 = vadd.f32 %v951_v17, %v950_v48  ;;  %v761_v24 = vsel %vm1992_vm4, %v1914_v14, %v757_v7  ;;  %v2043_v7 = vpop.permute.xlu2 %830 }
 0x121   :  { %v956_v44 = vadd.f32 %v955_v16, %v954_v3  ;;  %v961_v8 = vrot.slane %v960_v63, 2  ;;  %1168 = vrcp.f32 %v1982_v38  ;;  %vm763_vm5 = vcmp.eq.f32.partialorder %v762_v4, 8.507059e+37 }
 0x122   :  { %v765_v15 = vor.u32 1.1754944e-38, %v764_v51  ;;  %v779_v31 = vand.u32 2147483648, %v1865_v39  ;;  %v585_v10 = vadd.f32 %v581_v28, %v1874_v13  ;;  %v591_v19 = vmul.f32 %v589_v47, %v583_v61 }
 0x123   :  { %v957_v32 = vrot.slane %v956_v44, 1  ;;  %v962_v22 = vadd.f32 %v961_v8, %v960_v63  ;;  %1170 = vrcp.f32 %v1997_v0  ;;  %v783_v33 = vmul.f32 %v1401_v2, %v736_v35 }
 0x124   :  { %v766_v11 = vsel %vm763_vm5, %v765_v15, %v761_v24  ;;  %v784_v26 = vmul.f32 %v1412_v21, %v751_v46  ;;  %v592_v43 = vmul.f32 %v589_v47, %v584_v55  ;;  %v776_v13 = vsel %vm2010_vm6, %v1922_v18, %v772_v58 }
 0x125   :  { %v586_v36 = vadd.f32 %v581_v28, %v1882_v25  ;;  %v2020_v30 = vadd.f32 %v957_v32, %v956_v44  ;;  %v963_v56 = vrot.slane %v962_v22, 1  ;;  %vm778_vm7 = vcmp.eq.f32.partialorder %v777_v50, 8.507059e+37 }
 0x126   :  { %v780_v39 = vor.u32 1.1754944e-38, %v779_v31  ;;  %v2024_v4 = vadd.f32 %v1905_v42, %v1721_v23  ;;  %v2028_v2 = vadd.f32 %v1917_v52, %v1724_v57  ;;  %v785_v51 = vmul.f32 %v1484_v45, %v766_v11 }
 0x127   :  { %v1169_v21 = vpop.eup %1168  ;;  %v593_v1 = vmul.f32 %v589_v47, %v585_v10  ;;  %v2031_v18 = vadd.f32 %v963_v56, %v962_v22  ;;  %1172 = vrcp.f32 %v2020_v30  ;;  %v787_v49 = vmul.f32 %v783_v33, %v591_v19 }
 0x128   :  { %v781_v25 = vsel %vm778_vm7, %v780_v39, %v776_v13  ;;  %v788_v5 = vmul.f32 %v784_v26, %v592_v43  ;;  %v966_v54 = vmul.f32 %v1169_v21, %v1982_v38  ;;  %v594_v23 = vmul.f32 %v589_v47, %v586_v36 }
 0x129   :  { %v1171_v48 = vpop.eup %1170  ;;  %v974_v42 = vand.u32 2147483647, %v1982_v38  ;;  %v976_v57 = vand.u32 2147483648, %v1982_v38  ;;  %1174 = vrcp.f32 %v2031_v18  ;;  %v791_v45 = vadd.f32 %v787_v49, %v1902_v37 }
 0x12a   :  { %v2040_v52 = vadd.f32 %v788_v5, %v1910_v27  ;;  %v967_v3 = vsub.f32 1.0, %v966_v54  ;;  %v981_v12 = vmul.f32 %v1171_v48, %v1997_v0  ;;  %v786_v6 = vmul.f32 %v1492_v62, %v781_v25 }
 0x12b   :  { %v789_v63 = vmul.f32 %v785_v51, %v593_v1  ;;  %v989_v28 = vand.u32 2147483647, %v1997_v0  ;;  %v991_v50 = vand.u32 2147483648, %v1997_v0  ;;  %vm970_vm8 = vweird.f32 %v1982_v38 }
 0x12c   :  { %v968_v17 = vmul.f32 %v1169_v21, %v967_v3  ;;  %vm971_vm10 = vweird.f32 %v1169_v21  ;;  %v982_v37 = vsub.f32 1.0, %v981_v12  ;;  %vm2049_vm9 = vcmp.eq.f32.partialorder %v974_v42, 8.507059e+37 }
 0x12d   :  { %v1173_v16 = vpop.eup %1172  ;;  %v977_v61 = vor.u32 1.1754944e-38, %v976_v57  ;;  %vm985_vm11 = vweird.f32 %v1997_v0  ;;  %v833_v62 = vmul.f32 %v2043_v7, %v1884_v41  ;;  %vm986_vm12 = vweird.f32 %v1171_v48  ;;  %vm972_vm13 = vmor %vm970_vm8, %vm971_vm10 }
 0x12e   :  { %v969_v55 = vadd.f32 %v1169_v21, %v968_v17  ;;  %v983_v35 = vmul.f32 %v1171_v48, %v982_v37  ;;  %v996_v46 = vmul.f32 %v1173_v16, %v2020_v30  ;;  %vm2057_vm14 = vcmp.eq.f32.partialorder %v989_v28, 8.507059e+37  ;;  %vm987_vm0 = vmor %vm985_vm11, %vm986_vm12 }
 0x12f   :  { %v1175_v53 = vpop.eup %1174  ;;  %v992_v58 = vor.u32 1.1754944e-38, %v991_v50  ;;  %vm1000_vm15 = vweird.f32 %v2020_v30  ;;  %v834_v47 = vmul.f32 %v2043_v7, %v1890_v29  ;;  %vm1001_vm1 = vweird.f32 %v1173_v16 }
 0x130   :  { %v973_v24 = vsel %vm972_vm13, %v1169_v21, %v969_v55  ;;  %v984_v44 = vadd.f32 %v1171_v48, %v983_v35  ;;  %v997_v41 = vsub.f32 1.0, %v996_v46  ;;  %v1011_v8 = vmul.f32 %v1175_v53, %v2031_v18  ;;  %vm1002_vm3 = vmor %vm1000_vm15, %vm1001_vm1 }
 0x131   :  { %v978_v15 = vsel %vm2049_vm9, %v977_v61, %v973_v24  ;;  %v1004_v31 = vand.u32 2147483647, %v2020_v30  ;;  %v1006_v10 = vand.u32 2147483648, %v2020_v30  ;;  %vm1016_vm2 = vweird.f32 %v1175_v53 }
 0x132   :  { %v988_v19 = vsel %vm987_vm0, %v1171_v48, %v984_v44  ;;  %v998_v32 = vmul.f32 %v1173_v16, %v997_v41  ;;  %v1012_v22 = vsub.f32 1.0, %v1011_v8  ;;  %v1025_v29 = vmul.f32 %v1498_v9, %v978_v15 }
 0x133   :  { %v993_v11 = vsel %vm2057_vm14, %v992_v58, %v988_v19  ;;  %v1019_v14 = vand.u32 2147483647, %v2031_v18  ;;  %v1021_v33 = vand.u32 2147483648, %v2031_v18  ;;  %v790_v36 = vmul.f32 %v786_v6, %v594_v23 }
 0x134   :  { %v999_v0 = vadd.f32 %v1173_v16, %v998_v32  ;;  %v1013_v26 = vmul.f32 %v1175_v53, %v1012_v22  ;;  %v1026_v43 = vmul.f32 %v1517_v20, %v993_v11  ;;  %v1029_v13 = vmul.f32 %v1025_v29, %v833_v62 }
 0x135   :  { %vm1005_vm4 = vcmp.eq.f32.partialorder %v1004_v31, 8.507059e+37  ;;  %v1007_v9 = vor.u32 1.1754944e-38, %v1006_v10  ;;  %vm1015_vm5 = vweird.f32 %v2031_v18  ;;  %v793_v1 = vadd.f32 %v789_v63, %v2024_v4 }
 0x136   :  { %v1003_v56 = vsel %vm1002_vm3, %v1173_v16, %v999_v0  ;;  %v1014_v39 = vadd.f32 %v1175_v53, %v1013_v26  ;;  %v1030_v21 = vmul.f32 %v1026_v43, %v834_v47  ;;  %v1033_v51 = vadd.f32 %v1029_v13, %v791_v45  ;;  %vm1017_vm6 = vmor %vm1015_vm5, %vm1016_vm2 }
 0x137   :  { %v1008_v25 = vsel %vm1005_vm4, %v1007_v9, %v1003_v56  ;;  %v1022_v20 = vor.u32 1.1754944e-38, %v1021_v33  ;;  %v835_v49 = vmul.f32 %v2043_v7, %v1892_v40  ;;  %vm1020_vm7 = vcmp.eq.f32.partialorder %v1019_v14, 8.507059e+37 }
 0x138   :  { %v1018_v5 = vsel %vm1017_vm6, %v1175_v53, %v1014_v39  ;;  %v1027_v30 = vmul.f32 %v1519_v59, %v1008_v25  ;;  %v1034_v54 = vadd.f32 %v1030_v21, %v2040_v52  ;;  %1037 = vst [vmem:[%s2108_s5] sm:$0xff] %v1033_v51  ;;  %v794_v4 = vadd.f32 %v790_v36, %v2028_v2 }
 0x139   :  { %v1023_v18 = vsel %vm1020_vm7, %v1022_v20, %v1018_v5  ;;  %v836_v23 = vmul.f32 %v2043_v7, %v1896_v60 }
 0x13a   :  { %v1028_v48 = vmul.f32 %v1551_v34, %v1023_v18  ;;  %v1031_v42 = vmul.f32 %v1027_v30, %v835_v49  ;;  %1038 = vst [vmem:[%s2108_s5 + $0x8] sm:$0xff] %v1034_v54 }
 0x13c   :  { %v1032_v59 = vmul.f32 %v1028_v48, %v836_v23  ;;  %v1035_v40 = vadd.f32 %v1031_v42, %v793_v1 }
 0x13e   :  { %v1036_v57 = vadd.f32 %v1032_v59, %v794_v4  ;;  %1039 = vst [vmem:[%s2108_s5 + $0x10] sm:$0xff] %v1035_v40 }
 0x140   :  { %1040 = vst [vmem:[%s2108_s5 + $0x18] sm:$0xff] %v1036_v57 }

</bundles_post_ra>
